<compile_context>
chip_gen: v7x
topology: tpu7x:2x2x1
jax: 0.10.0
libtpu: 0.0.40
codegen_flags: <defaults>
</compile_context>

<pallas_src>
import functools

import jax
import jax.numpy as jnp
from jax.experimental import pallas as pl
from jax.experimental.pallas import tpu as pltpu


def _round_up(v, m):
    return (v + m - 1) // m * m


# ---------------------------------------------------------------------------
# One-time (cached) lowering probes.
# ---------------------------------------------------------------------------

@functools.lru_cache(maxsize=None)
def _roll_mode(width, dtype_name):
    """+1: pltpu.roll(v,s,ax)[j] == v[(j+s)%n];  -1: == v[(j-s)%n] (np.roll);
    0: roll unusable for this width/dtype -> use slice+concat rotations."""
    dtype = jnp.dtype(dtype_name)

    def kern(x_ref, o_ref):
        o_ref[...] = pltpu.roll(x_ref[...], 1, axis=2)

    try:
        x = jnp.broadcast_to(jnp.arange(width, dtype=jnp.int32),
                             (2, 8, width)).astype(dtype)
        y = pl.pallas_call(
            kern, out_shape=jax.ShapeDtypeStruct((2, 8, width), dtype))(x)
        y = jax.block_until_ready(y)
        up = jnp.concatenate([x[..., 1:], x[..., :1]], axis=-1)    # v[(j+1)%n]
        if bool(jnp.array_equal(y, up)):
            return 1
        down = jnp.concatenate([x[..., -1:], x[..., :-1]], axis=-1)  # v[(j-1)%n]
        if bool(jnp.array_equal(y, down)):
            return -1
    except Exception:
        pass
    return 0


@functools.lru_cache(maxsize=None)
def _strided_rows_ok(H, W, dtype_name):
    """True iff a sublane-strided ref read (stride=2 on the H axis) lowers and is
    correct for this (H, W, dtype)."""
    dtype = jnp.dtype(dtype_name)
    H2 = H // 2

    def kern(x_ref, o_ref):
        o_ref[...] = x_ref[0, :, pl.ds(0, H2, stride=2), :]

    try:
        x = (jnp.arange(2 * H * W, dtype=jnp.int32) % 101
             ).reshape(1, 2, H, W).astype(dtype)
        y = pl.pallas_call(
            kern, out_shape=jax.ShapeDtypeStruct((2, H2, W), dtype))(x)
        y = jax.block_until_ready(y)
        return bool(jnp.array_equal(y, x[0, :, ::2, :]))
    except Exception:
        return False


# ---------------------------------------------------------------------------
# Kernel.
# ---------------------------------------------------------------------------

def _build_kernel(H, W, roll_mode, strided_rows):
    H2, W2 = H // 2, W // 2

    def rot_concat(u, step, axis):
        # out[..., q, ...] = u[..., (q + step) % n, ...]  (known-good fallback)
        n = u.shape[axis]
        step %= n
        if step == 0:
            return u
        hi = jax.lax.slice_in_dim(u, step, n, axis=axis)
        lo = jax.lax.slice_in_dim(u, 0, step, axis=axis)
        return jnp.concatenate([hi, lo], axis=axis)

    def rot_lane(u, step, axis):
        # Same semantics as rot_concat, but as a single XLU rotation when available.
        n = u.shape[axis]
        step %= n
        if step == 0:
            return u
        if roll_mode == 1:
            return pltpu.roll(u, step, axis=axis)
        if roll_mode == -1:
            return pltpu.roll(u, n - step, axis=axis)
        return rot_concat(u, step, axis)

    def deinterleave(v, axis, masks, rot):
        """Return (v[.. ::2 ..], v[.. 1::2 ..]) along `axis` with a log-depth
        conditional-rotation network.  For kept destination j the read chain only
        visits positions <= 2j+1 <= n-1, so no mod-n wraparound occurs and the
        network is a bit-exact permutation for any even n."""
        n = v.shape[axis]
        half = n // 2
        nbits = max(1, (half - 1).bit_length())
        outs = []
        for parity in (0, 1):
            u = rot(v, 1, axis) if parity else v
            for i in range(nbits):
                u = jnp.where(masks[i], rot(u, 1 << i, axis), u)
            outs.append(jax.lax.slice_in_dim(u, 0, half, axis=axis))
        return outs

    def kernel(x_ref, o_ref):
        # x_ref block: (1, tc, H, W);  o_ref block: (1, 4, tc, H2, W2)
        tc = x_ref.shape[1]

        # Hoisted lane-index + per-bit masks, shared by all four column extractions.
        nbits_w = max(1, (W2 - 1).bit_length())
        lane = jax.lax.broadcasted_iota(jnp.int32, (tc, H2, W), 2)
        w_masks = [(lane & (1 << i)) != 0 for i in range(nbits_w)]

        rows_o_fallback = None
        if strided_rows:
            # Row parity straight off the ref (cheap sublane-strided load).
            rows_e = x_ref[0, :, pl.ds(0, H2, stride=2), :]        # x[..., ::2, :]
        else:
            # Fallback: in-register sublane deinterleave of the whole tile.
            nbits_h = max(1, (H2 - 1).bit_length())
            row = jax.lax.broadcasted_iota(jnp.int32, (tc, H, W), 1)
            h_masks = [(row & (1 << i)) != 0 for i in range(nbits_h)]
            v = x_ref[0]
            rows_e, rows_o_fallback = deinterleave(v, 1, h_masks, rot_concat)

        # Finish (and store) the even-row stream before producing the odd rows,
        # so only one half-height intermediate is live at a time.
        ee, eo = deinterleave(rows_e, 2, w_masks, rot_lane)
        o_ref[0, 0] = ee                                           # x[..., ::2,  ::2]
        o_ref[0, 2] = eo                                           # x[..., ::2, 1::2]

        if strided_rows:
            rows_o = x_ref[0, :, pl.ds(1, H2, stride=2), :]        # x[..., 1::2, :]
        else:
            rows_o = rows_o_fallback
        oe, oo = deinterleave(rows_o, 2, w_masks, rot_lane)
        o_ref[0, 1] = oe                                           # x[..., 1::2,  ::2]
        o_ref[0, 3] = oo                                           # x[..., 1::2, 1::2]

    return kernel


# ---------------------------------------------------------------------------
# Wrapper.
# ---------------------------------------------------------------------------

def space_to_depth_pallas(x, *, tc=None):
    """x: (B, C, H, W) with even H, W.  Returns (B, 4*C, H//2, W//2)."""
    B, C, H, W = x.shape
    assert H % 2 == 0 and W % 2 == 0, "space_to_depth requires even spatial dims"
    H2, W2 = H // 2, W // 2
    itemsize = jnp.dtype(x.dtype).itemsize
    dtype_name = str(jnp.dtype(x.dtype))

    # Per-generation VMEM capacity (v5e/v6e: 128 MiB, v7x: 64 MiB).
    try:
        vmem_cap = int(pltpu.get_tpu_info().vmem_capacity_bytes)
    except Exception:
        vmem_cap = 64 * 1024 * 1024  # conservative default, valid everywhere

    def footprint(t):
        # Padded VMEM working set: 2x double-buffered input + 2x output blocks
        # plus in-kernel temporaries (row stream, network temp, iota, masks).
        in_blk = t * _round_up(H, 8) * _round_up(W, 128) * itemsize
        out_blk = 4 * t * _round_up(H2, 8) * _round_up(W2, 128) * itemsize
        stream = t * _round_up(H2, 8) * _round_up(W, 128) * max(itemsize, 4)
        return 2 * in_blk + 2 * out_blk + 8 * stream

    if tc is None:
        # Biggest channel tile whose raw block stays <= ~4 MiB and whose total
        # working set fits a per-generation budget (more, smaller steps also let
        # the ("parallel","parallel") grid shard across v7x's two TensorCores).
        budget = min(40 << 20, vmem_cap // 2)
        max_raw = 4 << 20
        tc = 1
        for t in range(1, C + 1):
            if C % t:
                continue
            if footprint(t) <= budget and t * H * W * itemsize <= max_raw:
                tc = t
    assert C % tc == 0, "channel count must be divisible by the channel tile"

    vmem_limit = int(min(0.75 * vmem_cap,
                         max(32 << 20, int(1.5 * footprint(tc)))))

    roll_mode = _roll_mode(W, dtype_name)
    strided_rows = _strided_rows_ok(H, W, dtype_name)
    kernel = _build_kernel(H, W, roll_mode, strided_rows)

    bytes_accessed = 2 * x.size * itemsize  # read everything, write everything

    out5 = pl.pallas_call(
        kernel,
        out_shape=jax.ShapeDtypeStruct((B, 4, C, H2, W2), x.dtype),
        grid=(B, C // tc),
        in_specs=[pl.BlockSpec((1, tc, H, W), lambda b, c: (b, c, 0, 0))],
        out_specs=pl.BlockSpec((1, 4, tc, H2, W2), lambda b, c: (b, 0, c, 0, 0)),
        compiler_params=pltpu.CompilerParams(
            dimension_semantics=("parallel", "parallel"),
            vmem_limit_bytes=vmem_limit),
        cost_estimate=pl.CostEstimate(
            flops=0, transcendentals=0, bytes_accessed=bytes_accessed),
    )(x)

    # (B, 4, C, H2, W2) -> (B, 4C, H2, W2): free merge of adjacent dims; exactly
    # torch.cat's channel-block ordering [ee | oe | eo | oo].
    return out5.reshape(B, 4 * C, H2, W2)


def space_to_depth_reference(x):
    return jnp.concatenate(
        [x[..., ::2, ::2], x[..., 1::2, ::2], x[..., ::2, 1::2], x[..., 1::2, 1::2]],
        axis=1)


if __name__ == "__main__":
    # Small shapes consistent with the module: batch=2, channels=4, spatial=16x16.
    B, C, H, W = 2, 4, 16, 16
    key = jax.random.PRNGKey(0)
    x = jax.random.normal(key, (B, C, H, W), dtype=jnp.float32)

    out = jax.block_until_ready(space_to_depth_pallas(x))

    ref = space_to_depth_reference(x)
    assert out.shape == (B, 4 * C, H // 2, W // 2), out.shape
    # Pure data movement: must be bit-exact.
    assert bool(jnp.array_equal(out, ref)), "mismatch vs reference"

    print("KERNEL_OK")
</pallas_src>

<mosaic_0001>
module attributes {stable_mosaic.version = 11 : i64} {
  func.func @kern(%arg0: memref<2x8x16xf32, #tpu.memory_space<vmem>>, %arg1: memref<2x8x16xf32, #tpu.memory_space<vmem>>) attributes {dimension_semantics = [], scalar_prefetch = 0 : i64, scratch_operands = 0 : i64, tpu.core_type = #tpu.core_type<tc>} {
    %c0 = arith.constant 0 : index
    %c0_0 = arith.constant 0 : index
    %c0_1 = arith.constant 0 : index
    %0 = vector.load %arg0[%c0, %c0_0, %c0_1] : memref<2x8x16xf32, #tpu.memory_space<vmem>>, vector<2x8x16xf32>
    %c1_i32 = arith.constant 1 : i32
    %1 = tpu.dynamic_rotate %0 by %c1_i32 dim 2 : vector<2x8x16xf32>, i32 -> vector<2x8x16xf32>
    %c0_2 = arith.constant 0 : index
    %c0_3 = arith.constant 0 : index
    %c0_4 = arith.constant 0 : index
    %2 = vector.load %arg1[%c0_2, %c0_3, %c0_4] : memref<2x8x16xf32, #tpu.memory_space<vmem>>, vector<2x8x16xf32>
    tpu.vector_store %arg1[%c0_2, %c0_3, %c0_4], %1 {strides = array<i32>} : memref<2x8x16xf32, #tpu.memory_space<vmem>>, vector<2x8x16xf32>,
    return
  }
}

module attributes {stable_mosaic.version = 11 : i64} {
  func.func @kern(%arg0: memref<1x2x16x16xf32, #tpu.memory_space<vmem>>, %arg1: memref<2x8x16xf32, #tpu.memory_space<vmem>>) attributes {dimension_semantics = [], scalar_prefetch = 0 : i64, scratch_operands = 0 : i64, tpu.core_type = #tpu.core_type<tc>} {
    %c0 = arith.constant 0 : index
    %c0_0 = arith.constant 0 : index
    %c0_1 = arith.constant 0 : index
    %c0_2 = arith.constant 0 : index
    %0 = tpu.strided_load %arg0[%c0, %c0_0, %c0_1, %c0_2] {strides = array<i32: 1, 1, 2, 1>} : memref<1x2x16x16xf32, #tpu.memory_space<vmem>>, vector<1x2x8x16xf32>
    %1 = vector.shape_cast %0 : vector<1x2x8x16xf32> to vector<2x8x16xf32>
    %c0_3 = arith.constant 0 : index
    %c0_4 = arith.constant 0 : index
    %c0_5 = arith.constant 0 : index
    %2 = vector.load %arg1[%c0_3, %c0_4, %c0_5] : memref<2x8x16xf32, #tpu.memory_space<vmem>>, vector<2x8x16xf32>
    tpu.vector_store %arg1[%c0_3, %c0_4, %c0_5], %1 {strides = array<i32>} : memref<2x8x16xf32, #tpu.memory_space<vmem>>, vector<2x8x16xf32>,
    return
  }
}

module attributes {stable_mosaic.version = 11 : i64} {
  func.func @kernel(%arg0: i32, %arg1: i32, %arg2: memref<1x4x16x16xf32, #tpu.memory_space<vmem>>, %arg3: memref<1x4x4x8x8xf32, #tpu.memory_space<vmem>>) attributes {dimension_semantics = [#tpu.dimension_semantics<parallel>, #tpu.dimension_semantics<parallel>], iteration_bounds = array<i64: 2, 1>, scalar_prefetch = 0 : i64, scratch_operands = 0 : i64, tpu.core_type = #tpu.core_type<tc>, window_params = [{transform_indices = @transform_0, window_bounds = array<i64: 1, 4, 16, 16>}, {transform_indices = @transform_1, window_bounds = array<i64: 1, 4, 4, 8, 8>}]} {
    %0 = tpu.iota {dimensions = array<i32: 2>} : vector<4x8x16xi32>
    %c1_i32 = arith.constant 1 : i32
    %1 = vector.broadcast %c1_i32 : i32 to vector<4x8x16xi32>
    %2 = arith.andi %0, %1 : vector<4x8x16xi32>
    %c0_i32 = arith.constant 0 : i32
    %3 = vector.broadcast %c0_i32 : i32 to vector<4x8x16xi32>
    %4 = arith.cmpi ne, %2, %3 : vector<4x8x16xi32>
    %c2_i32 = arith.constant 2 : i32
    %5 = vector.broadcast %c2_i32 : i32 to vector<4x8x16xi32>
    %6 = arith.andi %0, %5 : vector<4x8x16xi32>
    %c0_i32_0 = arith.constant 0 : i32
    %7 = vector.broadcast %c0_i32_0 : i32 to vector<4x8x16xi32>
    %8 = arith.cmpi ne, %6, %7 : vector<4x8x16xi32>
    %c4_i32 = arith.constant 4 : i32
    %9 = vector.broadcast %c4_i32 : i32 to vector<4x8x16xi32>
    %10 = arith.andi %0, %9 : vector<4x8x16xi32>
    %c0_i32_1 = arith.constant 0 : i32
    %11 = vector.broadcast %c0_i32_1 : i32 to vector<4x8x16xi32>
    %12 = arith.cmpi ne, %10, %11 : vector<4x8x16xi32>
    %13 = tpu.iota {dimensions = array<i32: 1>} : vector<4x16x16xi32>
    %c1_i32_2 = arith.constant 1 : i32
    %14 = vector.broadcast %c1_i32_2 : i32 to vector<4x16x16xi32>
    %15 = arith.andi %13, %14 : vector<4x16x16xi32>
    %c0_i32_3 = arith.constant 0 : i32
    %16 = vector.broadcast %c0_i32_3 : i32 to vector<4x16x16xi32>
    %17 = arith.cmpi ne, %15, %16 : vector<4x16x16xi32>
    %c2_i32_4 = arith.constant 2 : i32
    %18 = vector.broadcast %c2_i32_4 : i32 to vector<4x16x16xi32>
    %19 = arith.andi %13, %18 : vector<4x16x16xi32>
    %c0_i32_5 = arith.constant 0 : i32
    %20 = vector.broadcast %c0_i32_5 : i32 to vector<4x16x16xi32>
    %21 = arith.cmpi ne, %19, %20 : vector<4x16x16xi32>
    %c4_i32_6 = arith.constant 4 : i32
    %22 = vector.broadcast %c4_i32_6 : i32 to vector<4x16x16xi32>
    %23 = arith.andi %13, %22 : vector<4x16x16xi32>
    %c0_i32_7 = arith.constant 0 : i32
    %24 = vector.broadcast %c0_i32_7 : i32 to vector<4x16x16xi32>
    %25 = arith.cmpi ne, %23, %24 : vector<4x16x16xi32>
    %c0 = arith.constant 0 : index
    %c0_8 = arith.constant 0 : index
    %c0_9 = arith.constant 0 : index
    %c0_10 = arith.constant 0 : index
    %26 = vector.load %arg2[%c0, %c0_8, %c0_9, %c0_10] : memref<1x4x16x16xf32, #tpu.memory_space<vmem>>, vector<1x4x16x16xf32>
    %27 = vector.shape_cast %26 : vector<1x4x16x16xf32> to vector<4x16x16xf32>
    %28 = vector.extract_strided_slice %27 {offsets = [0, 1, 0], sizes = [4, 15, 16], strides = [1, 1, 1]} : vector<4x16x16xf32> to vector<4x15x16xf32>
    %29 = vector.extract_strided_slice %27 {offsets = [0, 0, 0], sizes = [4, 1, 16], strides = [1, 1, 1]} : vector<4x16x16xf32> to vector<4x1x16xf32>
    %30 = tpu.concatenate %28, %29 in 1 : vector<4x15x16xf32>, vector<4x1x16xf32> -> vector<4x16x16xf32>
    %31 = arith.select %17, %30, %27 : vector<4x16x16xi1>, vector<4x16x16xf32>
    %32 = vector.extract_strided_slice %31 {offsets = [0, 2, 0], sizes = [4, 14, 16], strides = [1, 1, 1]} : vector<4x16x16xf32> to vector<4x14x16xf32>
    %33 = vector.extract_strided_slice %31 {offsets = [0, 0, 0], sizes = [4, 2, 16], strides = [1, 1, 1]} : vector<4x16x16xf32> to vector<4x2x16xf32>
    %34 = tpu.concatenate %32, %33 in 1 : vector<4x14x16xf32>, vector<4x2x16xf32> -> vector<4x16x16xf32>
    %35 = arith.select %21, %34, %31 : vector<4x16x16xi1>, vector<4x16x16xf32>
    %36 = vector.extract_strided_slice %35 {offsets = [0, 4, 0], sizes = [4, 12, 16], strides = [1, 1, 1]} : vector<4x16x16xf32> to vector<4x12x16xf32>
    %37 = vector.extract_strided_slice %35 {offsets = [0, 0, 0], sizes = [4, 4, 16], strides = [1, 1, 1]} : vector<4x16x16xf32> to vector<4x4x16xf32>
    %38 = tpu.concatenate %36, %37 in 1 : vector<4x12x16xf32>, vector<4x4x16xf32> -> vector<4x16x16xf32>
    %39 = arith.select %25, %38, %35 : vector<4x16x16xi1>, vector<4x16x16xf32>
    %40 = vector.extract_strided_slice %39 {offsets = [0, 0, 0], sizes = [4, 8, 16], strides = [1, 1, 1]} : vector<4x16x16xf32> to vector<4x8x16xf32>
    %41 = vector.extract_strided_slice %27 {offsets = [0, 1, 0], sizes = [4, 15, 16], strides = [1, 1, 1]} : vector<4x16x16xf32> to vector<4x15x16xf32>
    %42 = vector.extract_strided_slice %27 {offsets = [0, 0, 0], sizes = [4, 1, 16], strides = [1, 1, 1]} : vector<4x16x16xf32> to vector<4x1x16xf32>
    %43 = tpu.concatenate %41, %42 in 1 : vector<4x15x16xf32>, vector<4x1x16xf32> -> vector<4x16x16xf32>
    %44 = vector.extract_strided_slice %43 {offsets = [0, 1, 0], sizes = [4, 15, 16], strides = [1, 1, 1]} : vector<4x16x16xf32> to vector<4x15x16xf32>
    %45 = vector.extract_strided_slice %43 {offsets = [0, 0, 0], sizes = [4, 1, 16], strides = [1, 1, 1]} : vector<4x16x16xf32> to vector<4x1x16xf32>
    %46 = tpu.concatenate %44, %45 in 1 : vector<4x15x16xf32>, vector<4x1x16xf32> -> vector<4x16x16xf32>
    %47 = arith.select %17, %46, %43 : vector<4x16x16xi1>, vector<4x16x16xf32>
    %48 = vector.extract_strided_slice %47 {offsets = [0, 2, 0], sizes = [4, 14, 16], strides = [1, 1, 1]} : vector<4x16x16xf32> to vector<4x14x16xf32>
    %49 = vector.extract_strided_slice %47 {offsets = [0, 0, 0], sizes = [4, 2, 16], strides = [1, 1, 1]} : vector<4x16x16xf32> to vector<4x2x16xf32>
    %50 = tpu.concatenate %48, %49 in 1 : vector<4x14x16xf32>, vector<4x2x16xf32> -> vector<4x16x16xf32>
    %51 = arith.select %21, %50, %47 : vector<4x16x16xi1>, vector<4x16x16xf32>
    %52 = vector.extract_strided_slice %51 {offsets = [0, 4, 0], sizes = [4, 12, 16], strides = [1, 1, 1]} : vector<4x16x16xf32> to vector<4x12x16xf32>
    %53 = vector.extract_strided_slice %51 {offsets = [0, 0, 0], sizes = [4, 4, 16], strides = [1, 1, 1]} : vector<4x16x16xf32> to vector<4x4x16xf32>
    %54 = tpu.concatenate %52, %53 in 1 : vector<4x12x16xf32>, vector<4x4x16xf32> -> vector<4x16x16xf32>
    %55 = arith.select %25, %54, %51 : vector<4x16x16xi1>, vector<4x16x16xf32>
    %56 = vector.extract_strided_slice %55 {offsets = [0, 0, 0], sizes = [4, 8, 16], strides = [1, 1, 1]} : vector<4x16x16xf32> to vector<4x8x16xf32>
    %57 = vector.extract_strided_slice %40 {offsets = [0, 0, 1], sizes = [4, 8, 15], strides = [1, 1, 1]} : vector<4x8x16xf32> to vector<4x8x15xf32>
    %58 = vector.extract_strided_slice %40 {offsets = [0, 0, 0], sizes = [4, 8, 1], strides = [1, 1, 1]} : vector<4x8x16xf32> to vector<4x8x1xf32>
    %59 = tpu.concatenate %57, %58 in 2 : vector<4x8x15xf32>, vector<4x8x1xf32> -> vector<4x8x16xf32>
    %60 = arith.select %4, %59, %40 : vector<4x8x16xi1>, vector<4x8x16xf32>
    %61 = vector.extract_strided_slice %60 {offsets = [0, 0, 2], sizes = [4, 8, 14], strides = [1, 1, 1]} : vector<4x8x16xf32> to vector<4x8x14xf32>
    %62 = vector.extract_strided_slice %60 {offsets = [0, 0, 0], sizes = [4, 8, 2], strides = [1, 1, 1]} : vector<4x8x16xf32> to vector<4x8x2xf32>
    %63 = tpu.concatenate %61, %62 in 2 : vector<4x8x14xf32>, vector<4x8x2xf32> -> vector<4x8x16xf32>
    %64 = arith.select %8, %63, %60 : vector<4x8x16xi1>, vector<4x8x16xf32>
    %65 = vector.extract_strided_slice %64 {offsets = [0, 0, 4], sizes = [4, 8, 12], strides = [1, 1, 1]} : vector<4x8x16xf32> to vector<4x8x12xf32>
    %66 = vector.extract_strided_slice %64 {offsets = [0, 0, 0], sizes = [4, 8, 4], strides = [1, 1, 1]} : vector<4x8x16xf32> to vector<4x8x4xf32>
    %67 = tpu.concatenate %65, %66 in 2 : vector<4x8x12xf32>, vector<4x8x4xf32> -> vector<4x8x16xf32>
    %68 = arith.select %12, %67, %64 : vector<4x8x16xi1>, vector<4x8x16xf32>
    %69 = vector.extract_strided_slice %68 {offsets = [0, 0, 0], sizes = [4, 8, 8], strides = [1, 1, 1]} : vector<4x8x16xf32> to vector<4x8x8xf32>
    %70 = vector.extract_strided_slice %40 {offsets = [0, 0, 1], sizes = [4, 8, 15], strides = [1, 1, 1]} : vector<4x8x16xf32> to vector<4x8x15xf32>
    %71 = vector.extract_strided_slice %40 {offsets = [0, 0, 0], sizes = [4, 8, 1], strides = [1, 1, 1]} : vector<4x8x16xf32> to vector<4x8x1xf32>
    %72 = tpu.concatenate %70, %71 in 2 : vector<4x8x15xf32>, vector<4x8x1xf32> -> vector<4x8x16xf32>
    %73 = vector.extract_strided_slice %72 {offsets = [0, 0, 1], sizes = [4, 8, 15], strides = [1, 1, 1]} : vector<4x8x16xf32> to vector<4x8x15xf32>
    %74 = vector.extract_strided_slice %72 {offsets = [0, 0, 0], sizes = [4, 8, 1], strides = [1, 1, 1]} : vector<4x8x16xf32> to vector<4x8x1xf32>
    %75 = tpu.concatenate %73, %74 in 2 : vector<4x8x15xf32>, vector<4x8x1xf32> -> vector<4x8x16xf32>
    %76 = arith.select %4, %75, %72 : vector<4x8x16xi1>, vector<4x8x16xf32>
    %77 = vector.extract_strided_slice %76 {offsets = [0, 0, 2], sizes = [4, 8, 14], strides = [1, 1, 1]} : vector<4x8x16xf32> to vector<4x8x14xf32>
    %78 = vector.extract_strided_slice %76 {offsets = [0, 0, 0], sizes = [4, 8, 2], strides = [1, 1, 1]} : vector<4x8x16xf32> to vector<4x8x2xf32>
    %79 = tpu.concatenate %77, %78 in 2 : vector<4x8x14xf32>, vector<4x8x2xf32> -> vector<4x8x16xf32>
    %80 = arith.select %8, %79, %76 : vector<4x8x16xi1>, vector<4x8x16xf32>
    %81 = vector.extract_strided_slice %80 {offsets = [0, 0, 4], sizes = [4, 8, 12], strides = [1, 1, 1]} : vector<4x8x16xf32> to vector<4x8x12xf32>
    %82 = vector.extract_strided_slice %80 {offsets = [0, 0, 0], sizes = [4, 8, 4], strides = [1, 1, 1]} : vector<4x8x16xf32> to vector<4x8x4xf32>
    %83 = tpu.concatenate %81, %82 in 2 : vector<4x8x12xf32>, vector<4x8x4xf32> -> vector<4x8x16xf32>
    %84 = arith.select %12, %83, %80 : vector<4x8x16xi1>, vector<4x8x16xf32>
    %85 = vector.extract_strided_slice %84 {offsets = [0, 0, 0], sizes = [4, 8, 8], strides = [1, 1, 1]} : vector<4x8x16xf32> to vector<4x8x8xf32>
    %c0_11 = arith.constant 0 : index
    %c0_12 = arith.constant 0 : index
    %c0_13 = arith.constant 0 : index
    %c0_14 = arith.constant 0 : index
    %c0_15 = arith.constant 0 : index
    %86 = vector.load %arg3[%c0_11, %c0_12, %c0_13, %c0_14, %c0_15] : memref<1x4x4x8x8xf32, #tpu.memory_space<vmem>>, vector<1x1x4x8x8xf32>
    %87 = vector.shape_cast %86 : vector<1x1x4x8x8xf32> to vector<4x8x8xf32>
    %88 = vector.shape_cast %69 : vector<4x8x8xf32> to vector<1x1x4x8x8xf32>
    tpu.vector_store %arg3[%c0_11, %c0_12, %c0_13, %c0_14, %c0_15], %88 {strides = array<i32>} : memref<1x4x4x8x8xf32, #tpu.memory_space<vmem>>, vector<1x1x4x8x8xf32>,
    %c0_16 = arith.constant 0 : index
    %c2 = arith.constant 2 : index
    %c0_17 = arith.constant 0 : index
    %c0_18 = arith.constant 0 : index
    %c0_19 = arith.constant 0 : index
    %89 = vector.load %arg3[%c0_16, %c2, %c0_17, %c0_18, %c0_19] : memref<1x4x4x8x8xf32, #tpu.memory_space<vmem>>, vector<1x1x4x8x8xf32>
    %90 = vector.shape_cast %89 : vector<1x1x4x8x8xf32> to vector<4x8x8xf32>
    %91 = vector.shape_cast %85 : vector<4x8x8xf32> to vector<1x1x4x8x8xf32>
    tpu.vector_store %arg3[%c0_16, %c2, %c0_17, %c0_18, %c0_19], %91 {strides = array<i32>} : memref<1x4x4x8x8xf32, #tpu.memory_space<vmem>>, vector<1x1x4x8x8xf32>,
    %92 = vector.extract_strided_slice %56 {offsets = [0, 0, 1], sizes = [4, 8, 15], strides = [1, 1, 1]} : vector<4x8x16xf32> to vector<4x8x15xf32>
    %93 = vector.extract_strided_slice %56 {offsets = [0, 0, 0], sizes = [4, 8, 1], strides = [1, 1, 1]} : vector<4x8x16xf32> to vector<4x8x1xf32>
    %94 = tpu.concatenate %92, %93 in 2 : vector<4x8x15xf32>, vector<4x8x1xf32> -> vector<4x8x16xf32>
    %95 = arith.select %4, %94, %56 : vector<4x8x16xi1>, vector<4x8x16xf32>
    %96 = vector.extract_strided_slice %95 {offsets = [0, 0, 2], sizes = [4, 8, 14], strides = [1, 1, 1]} : vector<4x8x16xf32> to vector<4x8x14xf32>
    %97 = vector.extract_strided_slice %95 {offsets = [0, 0, 0], sizes = [4, 8, 2], strides = [1, 1, 1]} : vector<4x8x16xf32> to vector<4x8x2xf32>
    %98 = tpu.concatenate %96, %97 in 2 : vector<4x8x14xf32>, vector<4x8x2xf32> -> vector<4x8x16xf32>
    %99 = arith.select %8, %98, %95 : vector<4x8x16xi1>, vector<4x8x16xf32>
    %100 = vector.extract_strided_slice %99 {offsets = [0, 0, 4], sizes = [4, 8, 12], strides = [1, 1, 1]} : vector<4x8x16xf32> to vector<4x8x12xf32>
    %101 = vector.extract_strided_slice %99 {offsets = [0, 0, 0], sizes = [4, 8, 4], strides = [1, 1, 1]} : vector<4x8x16xf32> to vector<4x8x4xf32>
    %102 = tpu.concatenate %100, %101 in 2 : vector<4x8x12xf32>, vector<4x8x4xf32> -> vector<4x8x16xf32>
    %103 = arith.select %12, %102, %99 : vector<4x8x16xi1>, vector<4x8x16xf32>
    %104 = vector.extract_strided_slice %103 {offsets = [0, 0, 0], sizes = [4, 8, 8], strides = [1, 1, 1]} : vector<4x8x16xf32> to vector<4x8x8xf32>
    %105 = vector.extract_strided_slice %56 {offsets = [0, 0, 1], sizes = [4, 8, 15], strides = [1, 1, 1]} : vector<4x8x16xf32> to vector<4x8x15xf32>
    %106 = vector.extract_strided_slice %56 {offsets = [0, 0, 0], sizes = [4, 8, 1], strides = [1, 1, 1]} : vector<4x8x16xf32> to vector<4x8x1xf32>
    %107 = tpu.concatenate %105, %106 in 2 : vector<4x8x15xf32>, vector<4x8x1xf32> -> vector<4x8x16xf32>
    %108 = vector.extract_strided_slice %107 {offsets = [0, 0, 1], sizes = [4, 8, 15], strides = [1, 1, 1]} : vector<4x8x16xf32> to vector<4x8x15xf32>
    %109 = vector.extract_strided_slice %107 {offsets = [0, 0, 0], sizes = [4, 8, 1], strides = [1, 1, 1]} : vector<4x8x16xf32> to vector<4x8x1xf32>
    %110 = tpu.concatenate %108, %109 in 2 : vector<4x8x15xf32>, vector<4x8x1xf32> -> vector<4x8x16xf32>
    %111 = arith.select %4, %110, %107 : vector<4x8x16xi1>, vector<4x8x16xf32>
    %112 = vector.extract_strided_slice %111 {offsets = [0, 0, 2], sizes = [4, 8, 14], strides = [1, 1, 1]} : vector<4x8x16xf32> to vector<4x8x14xf32>
    %113 = vector.extract_strided_slice %111 {offsets = [0, 0, 0], sizes = [4, 8, 2], strides = [1, 1, 1]} : vector<4x8x16xf32> to vector<4x8x2xf32>
    %114 = tpu.concatenate %112, %113 in 2 : vector<4x8x14xf32>, vector<4x8x2xf32> -> vector<4x8x16xf32>
    %115 = arith.select %8, %114, %111 : vector<4x8x16xi1>, vector<4x8x16xf32>
    %116 = vector.extract_strided_slice %115 {offsets = [0, 0, 4], sizes = [4, 8, 12], strides = [1, 1, 1]} : vector<4x8x16xf32> to vector<4x8x12xf32>
    %117 = vector.extract_strided_slice %115 {offsets = [0, 0, 0], sizes = [4, 8, 4], strides = [1, 1, 1]} : vector<4x8x16xf32> to vector<4x8x4xf32>
    %118 = tpu.concatenate %116, %117 in 2 : vector<4x8x12xf32>, vector<4x8x4xf32> -> vector<4x8x16xf32>
    %119 = arith.select %12, %118, %115 : vector<4x8x16xi1>, vector<4x8x16xf32>
    %120 = vector.extract_strided_slice %119 {offsets = [0, 0, 0], sizes = [4, 8, 8], strides = [1, 1, 1]} : vector<4x8x16xf32> to vector<4x8x8xf32>
    %c0_20 = arith.constant 0 : index
    %c1 = arith.constant 1 : index
    %c0_21 = arith.constant 0 : index
    %c0_22 = arith.constant 0 : index
    %c0_23 = arith.constant 0 : index
    %121 = vector.load %arg3[%c0_20, %c1, %c0_21, %c0_22, %c0_23] : memref<1x4x4x8x8xf32, #tpu.memory_space<vmem>>, vector<1x1x4x8x8xf32>
    %122 = vector.shape_cast %121 : vector<1x1x4x8x8xf32> to vector<4x8x8xf32>
    %123 = vector.shape_cast %104 : vector<4x8x8xf32> to vector<1x1x4x8x8xf32>
    tpu.vector_store %arg3[%c0_20, %c1, %c0_21, %c0_22, %c0_23], %123 {strides = array<i32>} : memref<1x4x4x8x8xf32, #tpu.memory_space<vmem>>, vector<1x1x4x8x8xf32>,
    %c0_24 = arith.constant 0 : index
    %c3 = arith.constant 3 : index
    %c0_25 = arith.constant 0 : index
    %c0_26 = arith.constant 0 : index
    %c0_27 = arith.constant 0 : index
    %124 = vector.load %arg3[%c0_24, %c3, %c0_25, %c0_26, %c0_27] : memref<1x4x4x8x8xf32, #tpu.memory_space<vmem>>, vector<1x1x4x8x8xf32>
    %125 = vector.shape_cast %124 : vector<1x1x4x8x8xf32> to vector<4x8x8xf32>
    %126 = vector.shape_cast %120 : vector<4x8x8xf32> to vector<1x1x4x8x8xf32>
    tpu.vector_store %arg3[%c0_24, %c3, %c0_25, %c0_26, %c0_27], %126 {strides = array<i32>} : memref<1x4x4x8x8xf32, #tpu.memory_space<vmem>>, vector<1x1x4x8x8xf32>,
    return
  }
  func.func @transform_0(%arg0: i32, %arg1: i32) -> (i32, i32, i32, i32) {
    %c0_i32 = arith.constant 0 : i32
    %c0_i32_0 = arith.constant 0 : i32
    %c0_i32_1 = arith.constant 0 : i32
    return %arg0, %arg1, %c0_i32, %c0_i32_0 : i32, i32, i32, i32
  }
  func.func @transform_1(%arg0: i32, %arg1: i32) -> (i32, i32, i32, i32, i32) {
    %c0_i32 = arith.constant 0 : i32
    %c0_i32_0 = arith.constant 0 : i32
    %c0_i32_1 = arith.constant 0 : i32
    %c0_i32_2 = arith.constant 0 : i32
    return %arg0, %c0_i32, %arg1, %c0_i32_0, %c0_i32_1 : i32, i32, i32, i32, i32
  }
}

</mosaic_0001>

<bundles_post_ra>
// kernel: tpu_custom_call.1
= control target key start
LH: loop header
LB: loop body
LE: loop exit
PB: predicated region body
PF: predicated region fallthrough
CT: control target
= control target key end

     0   :  { %6 = vsyncpa [#allocation3], 0  ;;  %s166_s0 = inlined_call_operand.hbm [shape: f32[2,8,16], index: 0, kind: input, shape index: {}]   ;;  %s167_s1 = inlined_call_operand.hbm [shape: f32[2,8,16], index: 1, kind: output, shape index: {}]  }
   0x1   :  { %7 = vsyncpa [#allocation4], 0  ;;  %s120_s6 = smov [#allocation2]   ;;  %s72_s10 = scalar_lea.hbm %s166_s0, 256 }
   0x2   :  { %s13_s7 = sshll.u32 %s120_s6, 4  ;;  %p73_p0 = scmp.ne.s32.totalorder %s166_s0, %s72_s10  ;;  %s14_s7 = int_to_ptr.vmem [resolvable:$true] %s13_s7 }
   0x3   :  { %p76_p1 = scmp.lt.u32.totalorder %s72_s10, %s166_s0 }
   0x5   :  { %p78_p2 = pnand %p76_p1, %p73_p0 }
   0x7   :  { %81 = shalt.err (!%p78_p2)
}
   0x8   :  { %s82_s15 = scalar_lea.vmem %s14_s7, 256  ;;  %p87_p4 = scmp.lt.s32.totalorder %s14_s7, %s14_s7 }
   0x9   :  { %p83_p3 = scmp.ne.s32.totalorder %s14_s7, %s82_s15  ;;  %p88_p5 = scmp.lt.s32.totalorder %s82_s15, %s82_s15 }
   0xb   :  { %p89_p6 = por %p88_p5, %p87_p4 }
   0xd   :  { %p90_p7 = pnand %p89_p6, %p83_p3 }
   0xf   :  { %93 = shalt.err (!%p90_p7)
}
  0x10   :  { %s121_s16 = smov 128   ;;  %s122_s17 = smov 8  }
  0x11   :  { %19 = dma.hbm_to_vmem [thread:$0]  %s166_s0, 256, %s14_s7, [#allocation3], %s121_s16, %s121_s16, %s122_s17  }
  0x12   :  { %116 = dma.done.wait [#allocation3], 256  }
  0x13   :  { %117 = vsyncadd [#allocation3], 4294967040  ;;  %v23_v0 = vld [vmem:[#allocation2] sm:$0xff]  ;;  %s123_s20 = smov 16   ;;  %v24_v1 = vld [vmem:[#allocation2 + $0x8] sm:$0xff]  ;;  %vm25_vm0 = vcmask 1047680  }
  0x14   :  { %26 = vrot.lane.b32.xlu0 %v23_v0, %s123_s20  ;;  %s124_s21 = smov 113   ;;  %vm46_vm1 = vcmask 130048   ;;  %s125_s0 = smov [#allocation5]  }
  0x15   :  { %s54_s22 = sshll.u32 %s125_s0, 4  ;;  %s55_s22 = int_to_ptr.vmem [resolvable:$true] %s54_s22 }
  0x16   :  { %s94_s23 = scalar_lea.vmem %s55_s22, 256  ;;  %p99_p9 = scmp.lt.s32.totalorder %s55_s22, %s55_s22 }
  0x17   :  { %p95_p8 = scmp.ne.s32.totalorder %s55_s22, %s94_s23  ;;  %p100_p10 = scmp.lt.s32.totalorder %s94_s23, %s94_s23 }
  0x18   :  { %29 = vrot.lane.b32.xlu0 %v24_v1, %s123_s20 }
  0x19   :  { %p101_p11 = por %p100_p10, %p99_p9 }
  0x1b   :  { %p102_p12 = pnand %p101_p11, %p95_p8 }
  0x86   :  { %v27_v2 = vpop.permute.xlu0 %26 }
  0x87   :  { %v28_v3 = vsel %vm25_vm0, %v27_v2, %v23_v0 }
  0x88   :  { %32 = vrot.lane.b32.xlu1 %v28_v3, %s123_s20 }
  0x8a   :  { %v30_v4 = vpop.permute.xlu0 %29 }
  0x8b   :  { %v31_v5 = vsel %vm25_vm0, %v30_v4, %v24_v1 }
  0x8c   :  { %34 = vrot.lane.b32.xlu1 %v31_v5, %s123_s20 }
  0xfa   :  { %v33_v6 = vpop.permute.xlu1 %32 }
  0xfb   :  { %v36_v7 = vsel %vm25_vm0, %v33_v6, %v23_v0 }
  0xfc   :  { %40 = vrot.lane.b32.xlu0 %v36_v7, %s124_s21 }
  0xfe   :  { %v35_v8 = vpop.permute.xlu1 %34 }
  0xff   :  { %v37_v9 = vsel %vm25_vm0, %v35_v8, %v24_v1 }
 0x100   :  { %42 = vrot.lane.b32.xlu1 %v37_v9, %s124_s21 }
 0x16e   :  { %v41_v10 = vpop.permute.xlu0 %40 }
 0x16f   :  { %47 = vst.msk [vmem:[#allocation5] sm:$0xff] %vm46_vm1, %v41_v10 }
 0x172   :  { %v43_v11 = vpop.permute.xlu1 %42 }
 0x173   :  { %48 = vst.msk [vmem:[#allocation5 + $0x8] sm:$0xff] %vm46_vm1, %v43_v11 }
 0x174   :  { %105 = shalt.err (!%p102_p12)
}
 0x175   :  { %s106_s26 = scalar_lea.hbm %s167_s1, 256 }
 0x176   :  { %p107_p13 = scmp.ne.s32.totalorder %s167_s1, %s106_s26  ;;  %p110_p0 = scmp.lt.u32.totalorder %s106_s26, %s167_s1 }
 0x178   :  { %p112_p1 = pnand %p110_p0, %p107_p13 }
 0x17a   :  { %115 = shalt.err (!%p112_p1)
}
 0x17b   :  { %60 = dma.vmem_to_hbm [thread:$0]  %s55_s22, 256, %s167_s1, [#allocation4], %s121_s16, %s121_s16, %s122_s17  }
 0x17c   :  { %118 = dma.done.wait [#allocation4], 256  }
 0x17d   :  { %119 = vsyncadd [#allocation4], 4294967040 }
 0x17e   :  { %64 = vsyncpa [#allocation3], 1 }
 0x17f   :  { %65 = vsyncpa [#allocation4], 1 }

// kernel: tpu_custom_call.1
= control target key start
LH: loop header
LB: loop body
LE: loop exit
PB: predicated region body
PF: predicated region fallthrough
CT: control target
= control target key end

     0   :  { %6 = vsyncpa [#allocation3], 0  ;;  %s136_s0 = inlined_call_operand.hbm [shape: f32[1,2,16,16], index: 0, kind: input, shape index: {}]   ;;  %s137_s1 = inlined_call_operand.hbm [shape: f32[2,8,16], index: 1, kind: output, shape index: {}]  }
   0x1   :  { %7 = vsyncpa [#allocation4], 0  ;;  %s98_s6 = smov [#allocation2]   ;;  %s50_s10 = scalar_lea.hbm %s136_s0, 512 }
   0x2   :  { %s13_s7 = sshll.u32 %s98_s6, 4  ;;  %p51_p0 = scmp.ne.s32.totalorder %s136_s0, %s50_s10  ;;  %s14_s7 = int_to_ptr.vmem [resolvable:$true] %s13_s7 }
   0x3   :  { %p54_p1 = scmp.lt.u32.totalorder %s50_s10, %s136_s0 }
   0x5   :  { %p56_p2 = pnand %p54_p1, %p51_p0 }
   0x7   :  { %59 = shalt.err (!%p56_p2)
}
   0x8   :  { %s60_s15 = scalar_lea.vmem %s14_s7, 512  ;;  %p65_p4 = scmp.lt.s32.totalorder %s14_s7, %s14_s7 }
   0x9   :  { %p61_p3 = scmp.ne.s32.totalorder %s14_s7, %s60_s15  ;;  %p66_p5 = scmp.lt.s32.totalorder %s60_s15, %s60_s15 }
   0xb   :  { %p67_p6 = por %p66_p5, %p65_p4 }
   0xd   :  { %p68_p7 = pnand %p67_p6, %p61_p3 }
   0xf   :  { %71 = shalt.err (!%p68_p7)
}
  0x10   :  { %s99_s16 = smov 128   ;;  %s100_s17 = smov 8  }
  0x11   :  { %19 = dma.hbm_to_vmem [thread:$0]  %s136_s0, 512, %s14_s7, [#allocation3], %s99_s16, %s99_s16, %s100_s17  }
  0x12   :  { %94 = dma.done.wait [#allocation3], 512  }
  0x13   :  { %95 = vsyncadd [#allocation3], 4294966784  ;;  %s101_s20 = smov [#allocation5]   ;;  %vm26_vm0 = vcmask 130048   ;;  %v23_v0 = vld [vmem:[#allocation2] ss:$2 sm:$0xff] }
  0x14   :  { %s34_s21 = sshll.u32 %s101_s20, 4  ;;  %v25_v1 = vld [vmem:[#allocation2 + $0x10] ss:$2 sm:$0xff]  ;;  %27 = vst.msk [vmem:[#allocation5] sm:$0xff] %vm26_vm0, %v23_v0  ;;  %s35_s21 = int_to_ptr.vmem [resolvable:$true] %s34_s21 }
  0x15   :  { %28 = vst.msk [vmem:[#allocation5 + $0x8] sm:$0xff] %vm26_vm0, %v25_v1  ;;  %s72_s22 = scalar_lea.vmem %s35_s21, 256  ;;  %p77_p9 = scmp.lt.s32.totalorder %s35_s21, %s35_s21 }
  0x16   :  { %p73_p8 = scmp.ne.s32.totalorder %s35_s21, %s72_s22  ;;  %p78_p10 = scmp.lt.s32.totalorder %s72_s22, %s72_s22 }
  0x18   :  { %p79_p11 = por %p78_p10, %p77_p9 }
  0x1a   :  { %p80_p12 = pnand %p79_p11, %p73_p8 }
  0x1c   :  { %83 = shalt.err (!%p80_p12)
}
  0x1d   :  { %s84_s0 = scalar_lea.hbm %s137_s1, 256 }
  0x1e   :  { %p85_p13 = scmp.ne.s32.totalorder %s137_s1, %s84_s0  ;;  %p88_p0 = scmp.lt.u32.totalorder %s84_s0, %s137_s1 }
  0x20   :  { %p90_p1 = pnand %p88_p0, %p85_p13 }
  0x22   :  { %93 = shalt.err (!%p90_p1)
}
  0x23   :  { %40 = dma.vmem_to_hbm [thread:$0]  %s35_s21, 256, %s137_s1, [#allocation4], %s99_s16, %s99_s16, %s100_s17  }
  0x24   :  { %96 = dma.done.wait [#allocation4], 256  }
  0x25   :  { %97 = vsyncadd [#allocation4], 4294967040 }
  0x26   :  { %44 = vsyncpa [#allocation3], 1 }
  0x27   :  { %45 = vsyncpa [#allocation4], 1 }

// kernel: tpu_custom_call.1
= control target key start
LH: loop header
LB: loop body
LE: loop exit
PB: predicated region body
PF: predicated region fallthrough
CT: control target
= control target key end

     0   :  { %6 = vsyncpa [#allocation3], 0  ;;  %s2103_s0 = inlined_call_operand.hbm [shape: f32[2,4,16,16], index: 0, kind: input, shape index: {}]   ;;  %s2104_s1 = inlined_call_operand.hbm [shape: f32[2,4,4,8,8], index: 1, kind: output, shape index: {}]  }
   0x1   :  { %8 = vsyncpa [#allocation3 + $0x1], 0 }
   0x2   :  { %9 = vsyncpa [#allocation4], 0 }
   0x3   :  { %11 = vsyncpa [#allocation4 + $0x1], 0  ;;  %s1211_s6 = smov 0   ;;  %s1213_s7 = smov 0  }
   0x4   :  { %s1215_s8 = smov 0   ;;  %s1217_s9 = smov 0  }
   0x5   :  { %s1219_s10 = smov 0   ;;  %s1221_s11 = smov 0  }
   0x6 LB: > { %s974_s12 = sadd.s32 4294967295, %s1187_s11   ;;  %s975_s13 = sadd.s32 4294967294, %s1187_s11   ;;  %s1187_s11 = sphi %s1221_s11, %s17_s11   ;;  %s1183_s10 = sphi %s1219_s10, %s2135_s10   ;;  %s1179_s9 = sphi %s1217_s9, %s2134_s9   ;;  %s1175_s8 = sphi %s1215_s8, %s2133_s8   ;;  %s1171_s7 = sphi %s1213_s7, %s2132_s7   ;;  %s1167_s6 = sphi %s1211_s6, %s2131_s6  }
   0x7   : > { %s29_s14 = sadd.s32 1, %s1183_s10  ;;  %s38_s15 = sadd.s32 1, %s1175_s8 }
   0x8   : > { %p31_p0 = scmp.ge.s32.totalorder %s29_s14, 2  ;;  %p45_p1 = scmp.ne.s32.totalorder %s1175_s8, %s1171_s7 }
   0x9   : > { %p46_p2 = scmp.eq.s32.totalorder %s1187_s11, 0  ;;  %p51_p3 = scmp.ne.s32.totalorder %s1171_s7, %s1167_s6 }
   0xa   : > { %s2137_s14 = smov (%p31_p0, %s29_s14), 0  ;;  %p52_p5 = scmp.eq.s32.totalorder %s974_s12, 0 }
   0xb   : > { %p1252_p4 = por %p46_p2, %p45_p1  ;;  %s33_s17 = ssub.s32 %s1183_s10, %s2137_s14 }
   0xc   : > { %p77_p6 = scmp.eq.s32.totalorder %s974_s12, 1  ;;  %p36_p7 = scmp.eq.s32.totalorder %s33_s17, 0 }
   0xd   : > { %p1258_p8 = por %p52_p5, %p51_p3  ;;  %p83_p10 = scmp.eq.s32.totalorder %s975_s13, 1 }
   0xe   : > { %p1262_p9 = por %p77_p6, %p45_p1  ;;  %p1015_p13 = scmp.lt.s32.totalorder %s1187_s11, 2 }
   0xf   : > { %s1267_s20 = scalar_select %p36_p7, %s1175_s8, %s38_s15  }
  0x10   : > { %s2108_s19 = scalar_select %p1262_p9, 1, 0 }
  0x11   : > { %p1269_p11 = por %p83_p10, %p51_p3  ;;  %s103_s22 = sand.u32 1, %s1175_s8  }
  0x12   : > { %s978_s23 = sshll.u32 %s103_s22, 6  ;;  %s1001_s24 = sshll.u32 %s1183_s10, 10 }
  0x13   : > { %s2109_s21 = scalar_select %p1269_p11, 1, 0 }
  0x14   : > { %s1280_s27 = scalar_lea.hbm %s2103_s0, %s1001_s24  ;;  %s107_s28 = scalar_lea.vmem [#allocation2], %s978_s23 }
  0x15   : > { %s117_s29 = sshll.u32 %s107_s28, 4  ;;  %p1286_p0 = pnand %p1015_p13, %p1252_p4  ;;  %s1282_s29 = int_to_ptr.vmem [resolvable:$true] %s117_s29 }
  0x16   : > { %s1291_s2 = scalar_lea.sflag [#allocation3], %s103_s22  ;;  %s1075_s3 = scalar_lea.hbm %s1280_s27, 1024 }
  0x17   : > { %p1076_p2 = scmp.ne.s32.totalorder %s1280_s27, %s1075_s3  ;;  %p1077_p3 = pneg %p1286_p0 }
  0x18   : > { %s1080_s12 = scalar_lea.hbm %s2103_s0, 2048  ;;  %p1081_p4 = scmp.lt.u32.totalorder %s1280_s27, %s2103_s0 }
  0x19   : > { %p1078_p5 = pnand %p1077_p3, %p1076_p2  ;;  %p1082_p7 = scmp.lt.u32.totalorder %s1080_s12, %s1075_s3 }
  0x1a   : > { %p1084_p13 = scmp.lt.u32.totalorder %s1075_s3, %s1280_s27 }
  0x1b   : > { %p1079_p6 = pneg %p1078_p5  ;;  %p1083_p10 = por %p1082_p7, %p1081_p4 }
  0x1d   : > { %p1085_p12 = por %p1084_p13, %p1083_p10 }
  0x1f   : > { %p1086_p1 = pnand %p1085_p12, %p1079_p6 }
  0x21   : > { %1089 = shalt.err (!%p1086_p1)
}
  0x22   : > { %s1090_s16 = scalar_lea.vmem %s1282_s29, 1024  ;;  %s1189_s17 = smov [#allocation2]  }
  0x23   : > { %p1091_p2 = scmp.ne.s32.totalorder %s1282_s29, %s1090_s16  ;;  %s1095_s22 = sshll.u32 %s1189_s17, 4  ;;  %s1096_s22 = int_to_ptr.vmem [resolvable:$false] %s1095_s22 }
  0x24   : > { %s1097_s23 = scalar_lea.vmem %s1096_s22, 2048  ;;  %p1098_p9 = scmp.lt.s32.totalorder %s1282_s29, %s1096_s22 }
  0x25   : > { %p1093_p5 = pnand %p1091_p2, %p1077_p3  ;;  %p1099_p4 = scmp.lt.s32.totalorder %s1097_s23, %s1090_s16 }
  0x27   : > { %p1094_p11 = pneg %p1093_p5  ;;  %p1100_p7 = por %p1099_p4, %p1098_p9 }
  0x29   : > { %p1101_p10 = pnand %p1100_p7, %p1094_p11 }
  0x2b   : > { %1104 = shalt.err (!%p1101_p10)
}
  0x2c   : > { %s1190_s24 = smov 128   ;;  %s1191_s25 = smov 8  }
  0x2d   : > { %1010 = dma.hbm_to_vmem [thread:$0]  (!%p1286_p0), %s1280_s27, 1024, %s1282_s29, %s1291_s2, %s1190_s24, %s1190_s24, %s1191_s25  }
  0x2e   : > { %p125_p12 = scmp.lt.s32.totalorder %s1187_s11, 3  ;;  %p2111_p1 = scmp.ge.s32.totalorder %s1187_s11, 1 }
  0x30   : > { %p126_p3 = pnand %p2111_p1, %p125_p12 }
  0x31   : > { %s1323_s26 = sand.u32 (!%p126_p3), 1, %s1171_s7  }
  0x32   : > { %129 = sbr.rel (%p126_p3) target bundleno = 636 (0x27c), region = 24  ;;  %s982_s28 = sshll.u32 (!%p126_p3), %s1323_s26, 6 }
  0x33   : > { %s132_s3 = scalar_lea.sflag (!%p126_p3), [#allocation3], %s1323_s26  ;;  %s1327_s4 = scalar_lea.vmem (!%p126_p3), [#allocation2], %s982_s28 }
  0x39   : > { %1158 = dma.done.wait (%p1258_p8), %s132_s3, 1024  }
  0x3a   : > { %1160 = vsyncadd (%p1258_p8), %s132_s3, 4294966272  ;;  %v156_v0 = vlaneseq  ;;  %vm193_vm0 = vcmask 1046528   ;;  %vm238_vm1 = vcmask 1045504   ;;  %v181_v10 = vld [vmem:[%s1327_s4 + $0x20] sm:$0xff]  ;;  %v182_v11 = vld [vmem:[%s1327_s4 + $0x28] sm:$0xff]  ;;  %vm283_vm4 = vcmask 1043456  }
  0x3b   : > { %v200_v13 = vrot.slane %v181_v10, 1  ;;  %v201_v14 = vrot.slane %v182_v11, 1  ;;  %v177_v15 = vld [vmem:[%s1327_s4] sm:$0xff]  ;;  %v178_v16 = vld [vmem:[%s1327_s4 + $0x8] sm:$0xff]  ;;  %v183_v17 = vld [vmem:[%s1327_s4 + $0x30] sm:$0xff]  ;;  %s1192_s18 = smov 127  }
  0x3c   : > { %v165_v1 = vshrl.u32 %v156_v0, 7  ;;  %v194_v19 = vrot.slane %v177_v15, 1  ;;  %v195_v20 = vrot.slane %v178_v16, 1  ;;  %v184_v21 = vld [vmem:[%s1327_s4 + $0x38] sm:$0xff]  ;;  %v203_v22 = vrot.slane %v183_v17, 1  ;;  %v179_v23 = vld [vmem:[%s1327_s4 + $0x10] sm:$0xff] }
  0x3d   : > { %v1362_v25 = vsel %vm193_vm0, %v200_v13, %v201_v14  ;;  %v1365_v26 = vsel %vm193_vm0, %v201_v14, %v200_v13  ;;  %v204_v27 = vrot.slane %v184_v21, 1  ;;  %v197_v31 = vrot.slane %v179_v23, 1  ;;  %v180_v52 = vld [vmem:[%s1327_s4 + $0x18] sm:$0xff]  ;;  %s1193_s27 = smov 15   ;;  %s1194_s29 = smov 126  }
  0x3e   : > { %v166_v2 = vadd.s32 8, %v165_v1  ;;  %v167_v3 = vand.u32 1, %v165_v1  ;;  %v171_v4 = vand.u32 2, %v165_v1  ;;  %v175_v5 = vand.u32 4, %v165_v1  ;;  %s1195_s30 = smov 14   ;;  %s1196_s2 = smov 124  }
  0x3f   : > { %v196_v30 = vsel %vm193_vm0, %v194_v19, %v195_v20  ;;  %v218_v34 = vsel %vm193_vm0, %v195_v20, %v194_v19  ;;  %v1380_v39 = vsel %vm193_vm0, %v203_v22, %v204_v27  ;;  %v1385_v43 = vsel %vm193_vm0, %v204_v27, %v203_v22  ;;  %s1197_s5 = smov 12   ;;  %s983_s12 = sshll.u32 %s1323_s26, 7 }
  0x40   : > { %v168_v6 = vand.u32 1, %v166_v2  ;;  %vm1334_vm2 = vcmp.ne.s32.totalorder %v167_v3, 0  ;;  %v172_v8 = vand.u32 2, %v166_v2  ;;  %vm1338_vm3 = vcmp.ne.s32.totalorder %v171_v4, 0  ;;  %s1949_s13 = scalar_lea.vmem [#allocation5], %s983_s12  ;;  %s1002_s15 = sshll.u32 %s1179_s9, 11 }
  0x41   : > { %vm1351_vm6 = vcmp.ne.s32.totalorder %v175_v5, 0  ;;  %v226_v28 = vsel %vm1334_vm2, %v1362_v25, %v181_v10  ;;  %v222_v35 = vsel %vm1334_vm2, %v196_v30, %v177_v15  ;;  %v308_v38 = vrot.slane %v196_v30, 1  ;;  %s887_s16 = sshll.u32 %s1949_s13, 4  ;;  %s2046_s23 = scalar_lea.hbm %s2104_s1, %s1002_s15  ;;  %s2048_s16 = int_to_ptr.vmem [resolvable:$true] %s887_s16 }
  0x42   : > { %vm1344_vm5 = vcmp.ne.s32.totalorder %v168_v6, 0  ;;  %vm1357_vm7 = vcmp.ne.s32.totalorder %v172_v8, 0  ;;  %v245_v32 = vrot.slane %v226_v28, 2  ;;  %v239_v37 = vrot.slane %v222_v35, 2  ;;  %s872_s9 = scalar_lea.sflag [#allocation4], %s1323_s26  ;;  %s1105_s24 = scalar_lea.vmem %s2048_s16, 2048 }
  0x43   : > { %v227_v29 = vsel %vm1344_vm5, %v1365_v26, %v182_v11  ;;  %v223_v36 = vsel %vm1344_vm5, %v218_v34, %v178_v16  ;;  %v228_v46 = vsel %vm1334_vm2, %v1380_v39, %v183_v17  ;;  %v229_v47 = vsel %vm1344_vm5, %v1385_v43, %v184_v21  ;;  %p1106_p8 = scmp.ne.s32.totalorder %s2048_s16, %s1105_s24  ;;  %p2128_p9 = scmp.ne.s32.totalorder %s2108_s19, 0 }
  0x44   : > { %v246_v33 = vrot.slane %v227_v29, 2  ;;  %v240_v42 = vrot.slane %v223_v36, 2  ;;  %v248_v55 = vrot.slane %v228_v46, 2  ;;  %v249_v56 = vrot.slane %v229_v47, 2  ;;  %s1198_s25 = smov [#allocation5]  }
  0x45   : > { %v317_v60 = vrot.slane %v1380_v39, 1  ;;  %v198_v1 = vrot.slane %v180_v52, 1  ;;  %v309_v5 = vrot.slane %v218_v34, 1  ;;  %vm444_vm8 = vcmask 121856   ;;  %p1107_p11 = pnand %p1106_p8, %p2128_p9  ;;  %s1109_s28 = sshll.u32 %s1198_s25, 4  ;;  %s1110_s28 = int_to_ptr.vmem [resolvable:$false] %s1109_s28 }
  0x46   : > { %v247_v40 = vsel %vm238_vm1, %v245_v32, %v246_v33  ;;  %v265_v41 = vsel %vm238_vm1, %v246_v33, %v245_v32  ;;  %v241_v50 = vsel %vm238_vm1, %v239_v37, %v240_v42  ;;  %v263_v51 = vsel %vm238_vm1, %v240_v42, %v239_v37  ;;  %s1111_s3 = scalar_lea.vmem %s1110_s28, 4096  ;;  %p1112_p6 = scmp.lt.s32.totalorder %s2048_s16, %s1110_s28 }
  0x47   : > { %v271_v44 = vsel %vm1338_vm3, %v247_v40, %v226_v28  ;;  %v272_v45 = vsel %vm1357_vm7, %v265_v41, %v227_v29  ;;  %v267_v53 = vsel %vm1338_vm3, %v241_v50, %v222_v35  ;;  %v268_v54 = vsel %vm1357_vm7, %v263_v51, %v223_v36  ;;  %p1108_p0 = pneg %p1107_p11  ;;  %p1113_p13 = scmp.lt.s32.totalorder %s1111_s3, %s1105_s24 }
  0x48   : > { %v290_v48 = vrot.slane %v271_v44, 4  ;;  %v291_v49 = vrot.slane %v272_v45, 4  ;;  %v284_v58 = vrot.slane %v267_v53, 4  ;;  %v285_v59 = vrot.slane %v268_v54, 4 }
  0x49   : > { %v250_v62 = vsel %vm238_vm1, %v248_v55, %v249_v56  ;;  %v266_v63 = vsel %vm238_vm1, %v249_v56, %v248_v55  ;;  %v199_v11 = vsel %vm193_vm0, %v197_v31, %v198_v1  ;;  %v219_v13 = vsel %vm193_vm0, %v198_v1, %v197_v31  ;;  %p1114_p2 = por %p1113_p13, %p1112_p6 }
  0x4a   : > { %v292_v57 = vsel %vm283_vm4, %v290_v48, %v291_v49  ;;  %v286_v2 = vsel %vm283_vm4, %v284_v58, %v285_v59  ;;  %v273_v3 = vsel %vm1338_vm3, %v250_v62, %v228_v46  ;;  %v274_v4 = vsel %vm1357_vm7, %v266_v63, %v229_v47 }
  0x4b   : > { %v1408_v61 = vsel %vm1351_vm6, %v292_v57, %v271_v44  ;;  %v1421_v6 = vsel %vm1351_vm6, %v286_v2, %v267_v53  ;;  %v293_v8 = vrot.slane %v273_v3, 4  ;;  %v294_v10 = vrot.slane %v274_v4, 4  ;;  %p1115_p5 = pnand %p1114_p2, %p1108_p0 }
  0x4c   : > { %424 = vrot.lane.b32.xlu1 %v1408_v61, %s1192_s18  ;;  %420 = vrot.lane.b32.xlu0 %v1421_v6, %s1192_s18  ;;  %v224_v14 = vsel %vm1334_vm2, %v199_v11, %v179_v23  ;;  %v311_v15 = vrot.slane %v199_v11, 1  ;;  %v310_v16 = vsel %vm193_vm0, %v308_v38, %v309_v5  ;;  %v225_v19 = vsel %vm1344_vm5, %v219_v13, %v180_v52 }
  0x4d   : > { %v295_v17 = vsel %vm283_vm4, %v293_v8, %v294_v10  ;;  %v242_v20 = vrot.slane %v224_v14, 2  ;;  %v312_v21 = vrot.slane %v219_v13, 1  ;;  %v243_v27 = vrot.slane %v225_v19, 2 }
  0x4e   : > { %v1435_v22 = vsel %vm1351_vm6, %v295_v17, %v273_v3  ;;  %v332_v28 = vsel %vm193_vm0, %v309_v5, %v308_v38  ;;  %v336_v23 = vsel %vm1334_vm2, %v310_v16, %v196_v30  ;;  %v318_v46 = vrot.slane %v1385_v43, 1 }
  0x4f   : > { %v313_v29 = vsel %vm193_vm0, %v311_v15, %v312_v21  ;;  %v333_v31 = vsel %vm193_vm0, %v312_v21, %v311_v15  ;;  %v337_v32 = vsel %vm1344_vm5, %v332_v28, %v218_v34  ;;  %v352_v33 = vrot.slane %v336_v23, 2 }
  0x50   : > { %426 = vrot.lane.b32.xlu1 %v1435_v22, %s1192_s18  ;;  %v244_v35 = vsel %vm238_vm1, %v242_v20, %v243_v27  ;;  %v264_v36 = vsel %vm238_vm1, %v243_v27, %v242_v20  ;;  %v338_v37 = vsel %vm1334_vm2, %v313_v29, %v199_v11  ;;  %v339_v30 = vsel %vm1344_vm5, %v333_v31, %v219_v13 }
  0x51   : > { %v269_v38 = vsel %vm1338_vm3, %v244_v35, %v224_v14  ;;  %v270_v40 = vsel %vm1357_vm7, %v264_v36, %v225_v19  ;;  %v355_v41 = vrot.slane %v338_v37, 2  ;;  %v356_v42 = vrot.slane %v339_v30, 2 }
  0x52   : > { %v287_v34 = vrot.slane %v269_v38, 4  ;;  %v288_v44 = vrot.slane %v270_v40, 4  ;;  %v353_v45 = vrot.slane %v337_v32, 2  ;;  %v314_v47 = vrot.slane %v1362_v25, 1 }
  0x53   : > { %v357_v48 = vsel %vm238_vm1, %v355_v41, %v356_v42  ;;  %v377_v49 = vsel %vm238_vm1, %v356_v42, %v355_v41  ;;  %v315_v50 = vrot.slane %v1365_v26, 1  ;;  %v319_v63 = vsel %vm193_vm0, %v317_v60, %v318_v46 }
  0x54   : > { %v289_v51 = vsel %vm283_vm4, %v287_v34, %v288_v44  ;;  %v382_v52 = vsel %vm1338_vm3, %v357_v48, %v338_v37  ;;  %v383_v53 = vsel %vm1357_vm7, %v377_v49, %v339_v30  ;;  %v354_v54 = vsel %vm238_vm1, %v352_v33, %v353_v45 }
  0x55   : > { %v1469_v55 = vsel %vm1351_vm6, %v289_v51, %v269_v38  ;;  %v399_v56 = vrot.slane %v382_v52, 4  ;;  %v400_v57 = vrot.slane %v383_v53, 4  ;;  %v376_v58 = vsel %vm238_vm1, %v353_v45, %v352_v33 }
  0x56   : > { %422 = vrot.lane.b32.xlu0 %v1469_v55, %s1192_s18  ;;  %434 = vrot.lane.b32.xlu1 %v1469_v55, %s1193_s27  ;;  %v380_v59 = vsel %vm1338_vm3, %v354_v54, %v336_v23  ;;  %v381_v62 = vsel %vm1357_vm7, %v376_v58, %v337_v32  ;;  %v335_v3 = vsel %vm193_vm0, %v318_v46, %v317_v60  ;;  %v1566_v45 = vand.u32 127, %v156_v0 }
  0x57   : > { %v401_v1 = vsel %vm283_vm4, %v399_v56, %v400_v57  ;;  %v396_v2 = vrot.slane %v380_v59, 4  ;;  %v397_v4 = vrot.slane %v381_v62, 4  ;;  %v342_v5 = vsel %vm1334_vm2, %v319_v63, %v1380_v39 }
  0x58   : > { %v343_v8 = vsel %vm1344_vm5, %v335_v3, %v1385_v43  ;;  %v316_v10 = vsel %vm193_vm0, %v314_v47, %v315_v50  ;;  %v361_v11 = vrot.slane %v342_v5, 2  ;;  %v334_v14 = vsel %vm193_vm0, %v315_v50, %v314_v47 }
  0x59   : > { %v362_v13 = vrot.slane %v343_v8, 2  ;;  %v1501_v60 = vsel %vm1351_vm6, %v401_v1, %v382_v52  ;;  %v340_v39 = vsel %vm1334_vm2, %v316_v10, %v1362_v25  ;;  %v341_v43 = vsel %vm1344_vm5, %v334_v14, %v1365_v26 }
  0x5a   : > { %432 = vrot.lane.b32.xlu0 %v1421_v6, %s1193_s27  ;;  %438 = vrot.lane.b32.xlu1 %v1435_v22, %s1193_s27  ;;  %v358_v17 = vrot.slane %v340_v39, 2  ;;  %v359_v19 = vrot.slane %v341_v43, 2  ;;  %v398_v20 = vsel %vm283_vm4, %v396_v2, %v397_v4  ;;  %v158_v49 = vand.u32 1, %v1566_v45 }
  0x5b   : > { %v363_v15 = vsel %vm238_vm1, %v361_v11, %v362_v13  ;;  %v379_v16 = vsel %vm238_vm1, %v362_v13, %v361_v11  ;;  %v1528_v29 = vsel %vm1351_vm6, %v398_v20, %v380_v59  ;;  %vm481_vm10 = vcmask 113664  }
  0x5c   : > { %v386_v21 = vsel %vm1338_vm3, %v363_v15, %v342_v5  ;;  %v387_v27 = vsel %vm1357_vm7, %v379_v16, %v343_v8  ;;  %v360_v28 = vsel %vm238_vm1, %v358_v17, %v359_v19  ;;  %v378_v12 = vsel %vm238_vm1, %v359_v19, %v358_v17 }
  0x5d   : > { %v405_v7 = vrot.slane %v386_v21, 4  ;;  %v406_v25 = vrot.slane %v387_v27, 4  ;;  %v384_v26 = vsel %vm1338_vm3, %v360_v28, %v340_v39  ;;  %v385_v23 = vsel %vm1357_vm7, %v378_v12, %v341_v43 }
  0x5e   : > { %436 = vrot.lane.b32.xlu0 %v1408_v61, %s1193_s27  ;;  %651 = vrot.lane.b32.xlu1 %v1501_v60, %s1192_s18  ;;  %v402_v32 = vrot.slane %v384_v26, 4  ;;  %v403_v33 = vrot.slane %v385_v23, 4  ;;  %vm1580_vm9 = vcmp.ne.s32.totalorder %v158_v49, 0  ;;  %vm518_vm12 = vcmask 97280  }
  0x5f   : > { %v407_v31 = vsel %vm283_vm4, %v405_v7, %v406_v25  ;;  %vm635_vm14 = vcmask 64512  }
  0x60   : > { %v1533_v35 = vsel %vm1351_vm6, %v407_v31, %v386_v21  ;;  %v404_v36 = vsel %vm283_vm4, %v402_v32, %v403_v33  ;;  %v160_v33 = vand.u32 2, %v1566_v45 }
  0x61   : > { %v1542_v9 = vsel %vm1351_vm6, %v404_v36, %v384_v26 }
  0x62   : > { %649 = vrot.lane.b32.xlu0 %v1528_v29, %s1192_s18  ;;  %655 = vrot.lane.b32.xlu1 %v1533_v35, %s1192_s18  ;;  %vm1739_vm11 = vcmp.ne.s32.totalorder %v160_v33, 0 }
  0x66   : > { %653 = vrot.lane.b32.xlu0 %v1542_v9, %s1192_s18  ;;  %663 = vrot.lane.b32.xlu1 %v1501_v60, %s1193_s27 }
  0x6a   : > { %661 = vrot.lane.b32.xlu0 %v1528_v29, %s1193_s27  ;;  %667 = vrot.lane.b32.xlu1 %v1533_v35, %s1193_s27 }
  0x6e   : > { %665 = vrot.lane.b32.xlu0 %v1542_v9, %s1193_s27 }
  0xbe   : > { %v425_v24 = vpop.permute.xlu1 %424  ;;  %v421_v37 = vpop.permute.xlu0 %420 }
  0xc2   : > { %v427_v18 = vpop.permute.xlu1 %426 }
  0xc8   : > { %v423_v30 = vpop.permute.xlu0 %422  ;;  %v435_v38 = vpop.permute.xlu1 %434 }
  0xc9   : > { %v1555_v40 = vsel %vm444_vm8, %v423_v30, %v435_v38 }
  0xca   : > { %533 = vrot.lane.b32.xlu1 %v1555_v40, %s1192_s18  ;;  %v1592_v52 = vsel %vm1580_vm9, %v1555_v40, %v1469_v55 }
  0xcc   : > { %v433_v41 = vpop.permute.xlu0 %432  ;;  %v439_v42 = vpop.permute.xlu1 %438 }
  0xcd   : > { %v1560_v34 = vsel %vm444_vm8, %v421_v37, %v433_v41  ;;  %v1563_v44 = vsel %vm444_vm8, %v427_v18, %v439_v42 }
  0xce   : > { %531 = vrot.lane.b32.xlu0 %v1560_v34, %s1192_s18  ;;  %537 = vrot.lane.b32.xlu1 %v1563_v44, %s1192_s18  ;;  %v1602_v56 = vsel %vm1580_vm9, %v1560_v34, %v1421_v6  ;;  %v1608_v55 = vsel %vm1580_vm9, %v1563_v44, %v1435_v22 }
  0xd0   : > { %v437_v46 = vpop.permute.xlu0 %436  ;;  %v652_v47 = vpop.permute.xlu1 %651 }
  0xd1   : > { %v1573_v48 = vsel %vm444_vm8, %v425_v24, %v437_v46 }
  0xd2   : > { %535 = vrot.lane.b32.xlu0 %v1573_v48, %s1192_s18  ;;  %545 = vrot.lane.b32.xlu1 %v1555_v40, %s1193_s27  ;;  %v1621_v6 = vsel %vm1580_vm9, %v1573_v48, %v1408_v61 }
  0xd4   : > { %v650_v0 = vpop.permute.xlu0 %649  ;;  %v656_v51 = vpop.permute.xlu1 %655 }
  0xd6   : > { %543 = vrot.lane.b32.xlu0 %v1560_v34, %s1193_s27  ;;  %549 = vrot.lane.b32.xlu1 %v1563_v44, %s1193_s27 }
  0xd8   : > { %v654_v53 = vpop.permute.xlu0 %653  ;;  %v664_v54 = vpop.permute.xlu1 %663 }
  0xd9   : > { %v1615_v58 = vsel %vm444_vm8, %v652_v47, %v664_v54 }
  0xda   : > { %547 = vrot.lane.b32.xlu0 %v1573_v48, %s1193_s27  ;;  %459 = vrot.lane.b32.xlu1 %v1592_v52, %s1194_s29  ;;  %v1660_v1 = vsel %vm1580_vm9, %v1615_v58, %v1501_v60 }
  0xdc   : > { %v662_v57 = vpop.permute.xlu0 %661  ;;  %v668_v59 = vpop.permute.xlu1 %667 }
  0xdd   : > { %v1628_v22 = vsel %vm444_vm8, %v650_v0, %v662_v57  ;;  %v1631_v62 = vsel %vm444_vm8, %v656_v51, %v668_v59 }
  0xde   : > { %457 = vrot.lane.b32.xlu0 %v1602_v56, %s1194_s29  ;;  %463 = vrot.lane.b32.xlu1 %v1608_v55, %s1194_s29  ;;  %v1670_v2 = vsel %vm1580_vm9, %v1628_v22, %v1528_v29  ;;  %v1676_v3 = vsel %vm1580_vm9, %v1631_v62, %v1533_v35 }
  0xe0   : > { %v666_v63 = vpop.permute.xlu0 %665 }
  0xe1   : > { %v1638_v61 = vsel %vm444_vm8, %v654_v53, %v666_v63 }
  0xe2   : > { %461 = vrot.lane.b32.xlu0 %v1621_v6, %s1194_s29  ;;  %759 = vrot.lane.b32.xlu1 %v1615_v58, %s1192_s18  ;;  %v1686_v4 = vsel %vm1580_vm9, %v1638_v61, %v1542_v9 }
  0xe6   : > { %757 = vrot.lane.b32.xlu0 %v1628_v22, %s1192_s18  ;;  %763 = vrot.lane.b32.xlu1 %v1631_v62, %s1192_s18 }
  0xea   : > { %761 = vrot.lane.b32.xlu0 %v1638_v61, %s1192_s18  ;;  %771 = vrot.lane.b32.xlu1 %v1615_v58, %s1193_s27 }
  0xee   : > { %769 = vrot.lane.b32.xlu0 %v1628_v22, %s1193_s27  ;;  %775 = vrot.lane.b32.xlu1 %v1631_v62, %s1193_s27 }
  0xf2   : > { %773 = vrot.lane.b32.xlu0 %v1638_v61, %s1193_s27  ;;  %471 = vrot.lane.b32.xlu1 %v1592_v52, %s1195_s30 }
  0xf6   : > { %469 = vrot.lane.b32.xlu0 %v1602_v56, %s1195_s30  ;;  %475 = vrot.lane.b32.xlu1 %v1608_v55, %s1195_s30 }
  0xfa   : > { %473 = vrot.lane.b32.xlu0 %v1621_v6, %s1195_s30  ;;  %687 = vrot.lane.b32.xlu1 %v1660_v1, %s1194_s29 }
  0xfe   : > { %685 = vrot.lane.b32.xlu0 %v1670_v2, %s1194_s29  ;;  %691 = vrot.lane.b32.xlu1 %v1676_v3, %s1194_s29 }
 0x102   : > { %689 = vrot.lane.b32.xlu0 %v1686_v4, %s1194_s29  ;;  %699 = vrot.lane.b32.xlu1 %v1660_v1, %s1195_s30 }
 0x106   : > { %697 = vrot.lane.b32.xlu0 %v1670_v2, %s1195_s30  ;;  %703 = vrot.lane.b32.xlu1 %v1676_v3, %s1195_s30 }
 0x10a   : > { %701 = vrot.lane.b32.xlu0 %v1686_v4, %s1195_s30 }
 0x13c   : > { %v534_v5 = vpop.permute.xlu1 %533 }
 0x140   : > { %v532_v8 = vpop.permute.xlu0 %531  ;;  %v538_v10 = vpop.permute.xlu1 %537 }
 0x144   : > { %v536_v11 = vpop.permute.xlu0 %535  ;;  %v546_v13 = vpop.permute.xlu1 %545 }
 0x145   : > { %v556_v14 = vsel %vm444_vm8, %v534_v5, %v546_v13 }
 0x146   : > { %v1702_v60 = vsel %vm1580_vm9, %v556_v14, %v1555_v40 }
 0x147   : > { %569 = vrot.lane.b32.xlu1 %v1702_v60, %s1194_s29 }
 0x148   : > { %v544_v39 = vpop.permute.xlu0 %543  ;;  %v550_v43 = vpop.permute.xlu1 %549 }
 0x149   : > { %v555_v15 = vsel %vm444_vm8, %v532_v8, %v544_v39  ;;  %v558_v16 = vsel %vm444_vm8, %v538_v10, %v550_v43 }
 0x14a   : > { %v1711_v17 = vsel %vm1580_vm9, %v555_v15, %v1560_v34  ;;  %v1716_v19 = vsel %vm1580_vm9, %v558_v16, %v1563_v44 }
 0x14b   : > { %567 = vrot.lane.b32.xlu0 %v1711_v17, %s1194_s29  ;;  %573 = vrot.lane.b32.xlu1 %v1716_v19, %s1194_s29 }
 0x14c   : > { %v548_v20 = vpop.permute.xlu0 %547  ;;  %v460_v21 = vpop.permute.xlu1 %459 }
 0x14d   : > { %v557_v27 = vsel %vm444_vm8, %v536_v11, %v548_v20 }
 0x14e   : > { %v1726_v7 = vsel %vm1580_vm9, %v557_v27, %v1573_v48 }
 0x14f   : > { %571 = vrot.lane.b32.xlu0 %v1726_v7, %s1194_s29  ;;  %581 = vrot.lane.b32.xlu1 %v1702_v60, %s1195_s30 }
 0x150   : > { %v458_v25 = vpop.permute.xlu0 %457  ;;  %v464_v28 = vpop.permute.xlu1 %463 }
 0x153   : > { %579 = vrot.lane.b32.xlu0 %v1711_v17, %s1195_s30  ;;  %585 = vrot.lane.b32.xlu1 %v1716_v19, %s1195_s30 }
 0x154   : > { %v462_v12 = vpop.permute.xlu0 %461  ;;  %v760_v26 = vpop.permute.xlu1 %759 }
 0x157   : > { %583 = vrot.lane.b32.xlu0 %v1726_v7, %s1195_s30 }
 0x158   : > { %v758_v23 = vpop.permute.xlu0 %757  ;;  %v764_v29 = vpop.permute.xlu1 %763 }
 0x15c   : > { %v762_v31 = vpop.permute.xlu0 %761  ;;  %v772_v32 = vpop.permute.xlu1 %771 }
 0x15d   : > { %v782_v38 = vsel %vm444_vm8, %v760_v26, %v772_v32 }
 0x15e   : > { %v1761_v34 = vsel %vm1580_vm9, %v782_v38, %v1615_v58 }
 0x160   : > { %v770_v35 = vpop.permute.xlu0 %769  ;;  %v776_v36 = vpop.permute.xlu1 %775 }
 0x161   : > { %v781_v44 = vsel %vm444_vm8, %v758_v23, %v770_v35  ;;  %v784_v46 = vsel %vm444_vm8, %v764_v29, %v776_v36 }
 0x162   : > { %v1772_v48 = vsel %vm1580_vm9, %v781_v44, %v1628_v22  ;;  %v1777_v49 = vsel %vm1580_vm9, %v784_v46, %v1631_v62 }
 0x164   : > { %v774_v24 = vpop.permute.xlu0 %773  ;;  %v472_v37 = vpop.permute.xlu1 %471 }
 0x165   : > { %v483_v18 = vsel %vm481_vm10, %v460_v21, %v472_v37  ;;  %v783_v0 = vsel %vm444_vm8, %v762_v31, %v774_v24 }
 0x166   : > { %v1747_v30 = vsel %vm1739_vm11, %v483_v18, %v1592_v52  ;;  %v1787_v53 = vsel %vm1580_vm9, %v783_v0, %v1638_v61 }
 0x167   : > { %496 = vrot.lane.b32.xlu1 %v1747_v30, %s1196_s2 }
 0x168   : > { %v470_v40 = vpop.permute.xlu0 %469  ;;  %v476_v47 = vpop.permute.xlu1 %475 }
 0x169   : > { %v482_v41 = vsel %vm481_vm10, %v458_v25, %v470_v40 }
 0x16a   : > { %v1756_v42 = vsel %vm1739_vm11, %v482_v41, %v1602_v56  ;;  %v485_v56 = vsel %vm481_vm10, %v464_v28, %v476_v47 }
 0x16b   : > { %494 = vrot.lane.b32.xlu0 %v1756_v42, %s1196_s2  ;;  %795 = vrot.lane.b32.xlu1 %v1761_v34, %s1194_s29  ;;  %v1801_v50 = vsel %vm1739_vm11, %v485_v56, %v1608_v55 }
 0x16c   : > { %v474_v51 = vpop.permute.xlu0 %473  ;;  %v688_v52 = vpop.permute.xlu1 %687 }
 0x16d   : > { %v484_v58 = vsel %vm481_vm10, %v462_v12, %v474_v51 }
 0x16e   : > { %v1811_v62 = vsel %vm1739_vm11, %v484_v58, %v1621_v6 }
 0x16f   : > { %793 = vrot.lane.b32.xlu0 %v1772_v48, %s1194_s29  ;;  %799 = vrot.lane.b32.xlu1 %v1777_v49, %s1194_s29 }
 0x170   : > { %v686_v54 = vpop.permute.xlu0 %685  ;;  %v692_v57 = vpop.permute.xlu1 %691 }
 0x173   : > { %797 = vrot.lane.b32.xlu0 %v1787_v53, %s1194_s29  ;;  %807 = vrot.lane.b32.xlu1 %v1761_v34, %s1195_s30 }
 0x174   : > { %v690_v59 = vpop.permute.xlu0 %689  ;;  %v700_v22 = vpop.permute.xlu1 %699 }
 0x175   : > { %v710_v63 = vsel %vm481_vm10, %v688_v52, %v700_v22 }
 0x176   : > { %v1825_v6 = vsel %vm1739_vm11, %v710_v63, %v1660_v1 }
 0x177   : > { %805 = vrot.lane.b32.xlu0 %v1772_v48, %s1195_s30  ;;  %811 = vrot.lane.b32.xlu1 %v1777_v49, %s1195_s30 }
 0x178   : > { %v698_v55 = vpop.permute.xlu0 %697  ;;  %v704_v61 = vpop.permute.xlu1 %703 }
 0x179   : > { %v709_v5 = vsel %vm481_vm10, %v686_v54, %v698_v55  ;;  %v712_v8 = vsel %vm481_vm10, %v692_v57, %v704_v61 }
 0x17a   : > { %v1836_v11 = vsel %vm1739_vm11, %v709_v5, %v1670_v2  ;;  %v1841_v1 = vsel %vm1739_vm11, %v712_v8, %v1676_v3 }
 0x17b   : > { %809 = vrot.lane.b32.xlu0 %v1787_v53, %s1195_s30  ;;  %500 = vrot.lane.b32.xlu1 %v1801_v50, %s1196_s2 }
 0x17c   : > { %v702_v10 = vpop.permute.xlu0 %701 }
 0x17d   : > { %v711_v13 = vsel %vm481_vm10, %v690_v59, %v702_v10 }
 0x17e   : > { %v1851_v14 = vsel %vm1739_vm11, %v711_v13, %v1686_v4 }
 0x17f   : > { %498 = vrot.lane.b32.xlu0 %v1811_v62, %s1196_s2  ;;  %508 = vrot.lane.b32.xlu1 %v1747_v30, %s1197_s5 }
 0x183   : > { %506 = vrot.lane.b32.xlu0 %v1756_v42, %s1197_s5  ;;  %512 = vrot.lane.b32.xlu1 %v1801_v50, %s1197_s5 }
 0x187   : > { %510 = vrot.lane.b32.xlu0 %v1811_v62, %s1197_s5  ;;  %723 = vrot.lane.b32.xlu1 %v1825_v6, %s1196_s2 }
 0x18b   : > { %721 = vrot.lane.b32.xlu0 %v1836_v11, %s1196_s2  ;;  %727 = vrot.lane.b32.xlu1 %v1841_v1, %s1196_s2 }
 0x18f   : > { %725 = vrot.lane.b32.xlu0 %v1851_v14, %s1196_s2  ;;  %735 = vrot.lane.b32.xlu1 %v1825_v6, %s1197_s5 }
 0x193   : > { %733 = vrot.lane.b32.xlu0 %v1836_v11, %s1197_s5  ;;  %739 = vrot.lane.b32.xlu1 %v1841_v1, %s1197_s5 }
 0x197   : > { %737 = vrot.lane.b32.xlu0 %v1851_v14, %s1197_s5 }
 0x1b9   : > { %v570_v2 = vpop.permute.xlu1 %569 }
 0x1bd   : > { %v568_v3 = vpop.permute.xlu0 %567  ;;  %v574_v39 = vpop.permute.xlu1 %573 }
 0x1c1   : > { %v572_v4 = vpop.permute.xlu0 %571  ;;  %v582_v43 = vpop.permute.xlu1 %581 }
 0x1c2   : > { %v592_v15 = vsel %vm481_vm10, %v570_v2, %v582_v43 }
 0x1c3   : > { %v1867_v16 = vsel %vm1739_vm11, %v592_v15, %v1702_v60 }
 0x1c4   : > { %605 = vrot.lane.b32.xlu1 %v1867_v16, %s1196_s2 }
 0x1c5   : > { %v580_v20 = vpop.permute.xlu0 %579  ;;  %v586_v21 = vpop.permute.xlu1 %585 }
 0x1c6   : > { %v591_v27 = vsel %vm481_vm10, %v568_v3, %v580_v20  ;;  %v594_v25 = vsel %vm481_vm10, %v574_v39, %v586_v21 }
 0x1c7   : > { %v1876_v28 = vsel %vm1739_vm11, %v591_v27, %v1711_v17  ;;  %v1881_v12 = vsel %vm1739_vm11, %v594_v25, %v1716_v19 }
 0x1c8   : > { %603 = vrot.lane.b32.xlu0 %v1876_v28, %s1196_s2  ;;  %609 = vrot.lane.b32.xlu1 %v1881_v12, %s1196_s2 }
 0x1c9   : > { %v584_v60 = vpop.permute.xlu0 %583 }
 0x1ca   : > { %v593_v26 = vsel %vm481_vm10, %v572_v4, %v584_v60 }
 0x1cb   : > { %v1891_v23 = vsel %vm1739_vm11, %v593_v26, %v1726_v7 }
 0x1cc   : > { %607 = vrot.lane.b32.xlu0 %v1891_v23, %s1196_s2  ;;  %617 = vrot.lane.b32.xlu1 %v1867_v16, %s1197_s5 }
 0x1d0   : > { %615 = vrot.lane.b32.xlu0 %v1876_v28, %s1197_s5  ;;  %621 = vrot.lane.b32.xlu1 %v1881_v12, %s1197_s5 }
 0x1d4   : > { %619 = vrot.lane.b32.xlu0 %v1891_v23, %s1197_s5 }
 0x1d9   : > { %v497_v17 = vpop.permute.xlu1 %496 }
 0x1dd   : > { %v495_v19 = vpop.permute.xlu0 %494  ;;  %v796_v29 = vpop.permute.xlu1 %795 }
 0x1e1   : > { %v794_v7 = vpop.permute.xlu0 %793  ;;  %v800_v31 = vpop.permute.xlu1 %799 }
 0x1e5   : > { %v798_v32 = vpop.permute.xlu0 %797  ;;  %v808_v33 = vpop.permute.xlu1 %807 }
 0x1e6   : > { %v818_v35 = vsel %vm481_vm10, %v796_v29, %v808_v33 }
 0x1e7   : > { %v1907_v36 = vsel %vm1739_vm11, %v818_v35, %v1761_v34  ;;  %v162_v34 = vand.u32 4, %v1566_v45 }
 0x1e8   : > { %831 = vrot.lane.b32.xlu1 %v1907_v36, %s1196_s2 }
 0x1e9   : > { %v806_v24 = vpop.permute.xlu0 %805  ;;  %v812_v37 = vpop.permute.xlu1 %811  ;;  %vm1935_vm13 = vcmp.ne.s32.totalorder %v162_v34, 0 }
 0x1ea   : > { %v817_v18 = vsel %vm481_vm10, %v794_v7, %v806_v24  ;;  %v820_v38 = vsel %vm481_vm10, %v800_v31, %v812_v37 }
 0x1eb   : > { %v1916_v40 = vsel %vm1739_vm11, %v817_v18, %v1772_v48  ;;  %v1921_v41 = vsel %vm1739_vm11, %v820_v38, %v1777_v49 }
 0x1ec   : > { %829 = vrot.lane.b32.xlu0 %v1916_v40, %s1196_s2  ;;  %835 = vrot.lane.b32.xlu1 %v1921_v41, %s1196_s2 }
 0x1ed   : > { %v810_v44 = vpop.permute.xlu0 %809  ;;  %v501_v46 = vpop.permute.xlu1 %500 }
 0x1ee   : > { %v819_v47 = vsel %vm481_vm10, %v798_v32, %v810_v44 }
 0x1ef   : > { %v1933_v48 = vsel %vm1739_vm11, %v819_v47, %v1787_v53 }
 0x1f0   : > { %833 = vrot.lane.b32.xlu0 %v1933_v48, %s1196_s2  ;;  %843 = vrot.lane.b32.xlu1 %v1907_v36, %s1197_s5 }
 0x1f1   : > { %v499_v45 = vpop.permute.xlu0 %498  ;;  %v509_v0 = vpop.permute.xlu1 %508 }
 0x1f2   : > { %v520_v51 = vsel %vm518_vm12, %v497_v17, %v509_v0 }
 0x1f3   : > { %v524_v9 = vsel %vm1935_vm13, %v520_v51, %v1747_v30 }
 0x1f4   : > { %841 = vrot.lane.b32.xlu0 %v1916_v40, %s1197_s5  ;;  %637 = vst.msk [vmem:[%s1949_s13 + $0x8] sm:$0xff] %vm635_vm14, %v524_v9  ;;  %847 = vrot.lane.b32.xlu1 %v1921_v41, %s1197_s5 }
 0x1f5   : > { %v507_v52 = vpop.permute.xlu0 %506  ;;  %v513_v53 = vpop.permute.xlu1 %512 }
 0x1f6   : > { %v519_v54 = vsel %vm518_vm12, %v495_v19, %v507_v52  ;;  %v522_v30 = vsel %vm518_vm12, %v501_v46, %v513_v53 }
 0x1f7   : > { %v523_v56 = vsel %vm1935_vm13, %v519_v54, %v1756_v42  ;;  %v526_v57 = vsel %vm1935_vm13, %v522_v30, %v1801_v50 }
 0x1f8   : > { %636 = vst.msk [vmem:[%s1949_s13] sm:$0xff] %vm635_vm14, %v523_v56  ;;  %845 = vrot.lane.b32.xlu0 %v1933_v48, %s1197_s5  ;;  %639 = vst.msk [vmem:[%s1949_s13 + $0x18] sm:$0xff] %vm635_vm14, %v526_v57 }
 0x1f9   : > { %v511_v58 = vpop.permute.xlu0 %510  ;;  %v724_v59 = vpop.permute.xlu1 %723 }
 0x1fa   : > { %v521_v22 = vsel %vm518_vm12, %v499_v45, %v511_v58 }
 0x1fb   : > { %v525_v42 = vsel %vm1935_vm13, %v521_v22, %v1811_v62 }
 0x1fc   : > { %638 = vst.msk [vmem:[%s1949_s13 + $0x10] sm:$0xff] %vm635_vm14, %v525_v42 }
 0x1fd   : > { %v722_v50 = vpop.permute.xlu0 %721  ;;  %v728_v55 = vpop.permute.xlu1 %727 }
 0x201   : > { %v726_v63 = vpop.permute.xlu0 %725  ;;  %v736_v61 = vpop.permute.xlu1 %735 }
 0x202   : > { %v746_v5 = vsel %vm518_vm12, %v724_v59, %v736_v61 }
 0x203   : > { %v750_v8 = vsel %vm1935_vm13, %v746_v5, %v1825_v6 }
 0x204   : > { %989 = vst.msk [vmem:[%s1949_s13 + $0x28] sm:$0xff] %vm635_vm14, %v750_v8 }
 0x205   : > { %v734_v10 = vpop.permute.xlu0 %733  ;;  %v740_v13 = vpop.permute.xlu1 %739 }
 0x206   : > { %v745_v62 = vsel %vm518_vm12, %v722_v50, %v734_v10  ;;  %v748_v2 = vsel %vm518_vm12, %v728_v55, %v740_v13 }
 0x207   : > { %v749_v3 = vsel %vm1935_vm13, %v745_v62, %v1836_v11  ;;  %v752_v39 = vsel %vm1935_vm13, %v748_v2, %v1841_v1 }
 0x208   : > { %988 = vst.msk [vmem:[%s1949_s13 + $0x20] sm:$0xff] %vm635_vm14, %v749_v3  ;;  %991 = vst.msk [vmem:[%s1949_s13 + $0x38] sm:$0xff] %vm635_vm14, %v752_v39 }
 0x209   : > { %v738_v6 = vpop.permute.xlu0 %737 }
 0x20a   : > { %v747_v4 = vsel %vm518_vm12, %v726_v63, %v738_v6 }
 0x20b   : > { %v751_v43 = vsel %vm1935_vm13, %v747_v4, %v1851_v14 }
 0x20c   : > { %990 = vst.msk [vmem:[%s1949_s13 + $0x30] sm:$0xff] %vm635_vm14, %v751_v43 }
 0x236   : > { %v606_v11 = vpop.permute.xlu1 %605 }
 0x23a   : > { %v604_v15 = vpop.permute.xlu0 %603  ;;  %v610_v20 = vpop.permute.xlu1 %609 }
 0x23e   : > { %v608_v21 = vpop.permute.xlu0 %607  ;;  %v618_v1 = vpop.permute.xlu1 %617 }
 0x23f   : > { %v628_v27 = vsel %vm518_vm12, %v606_v11, %v618_v1 }
 0x240   : > { %v632_v25 = vsel %vm1935_vm13, %v628_v27, %v1867_v16 }
 0x241   : > { %985 = vst.msk [vmem:[%s1949_s13 + $0x48] sm:$0xff] %vm635_vm14, %v632_v25 }
 0x242   : > { %v616_v60 = vpop.permute.xlu0 %615  ;;  %v622_v14 = vpop.permute.xlu1 %621 }
 0x243   : > { %v627_v26 = vsel %vm518_vm12, %v604_v15, %v616_v60  ;;  %v630_v17 = vsel %vm518_vm12, %v610_v20, %v622_v14 }
 0x244   : > { %v631_v19 = vsel %vm1935_vm13, %v627_v26, %v1876_v28  ;;  %v634_v29 = vsel %vm1935_vm13, %v630_v17, %v1881_v12 }
 0x245   : > { %984 = vst.msk [vmem:[%s1949_s13 + $0x40] sm:$0xff] %vm635_vm14, %v631_v19  ;;  %987 = vst.msk [vmem:[%s1949_s13 + $0x58] sm:$0xff] %vm635_vm14, %v634_v29 }
 0x246   : > { %v620_v16 = vpop.permute.xlu0 %619 }
 0x247   : > { %v629_v7 = vsel %vm518_vm12, %v608_v21, %v620_v16 }
 0x248   : > { %v633_v31 = vsel %vm1935_vm13, %v629_v7, %v1891_v23 }
 0x249   : > { %986 = vst.msk [vmem:[%s1949_s13 + $0x50] sm:$0xff] %vm635_vm14, %v633_v31 }
 0x25a   : > { %v832_v28 = vpop.permute.xlu1 %831 }
 0x25e   : > { %v830_v32 = vpop.permute.xlu0 %829  ;;  %v836_v12 = vpop.permute.xlu1 %835 }
 0x262   : > { %v834_v33 = vpop.permute.xlu0 %833  ;;  %v844_v35 = vpop.permute.xlu1 %843 }
 0x263   : > { %v854_v24 = vsel %vm518_vm12, %v832_v28, %v844_v35 }
 0x264   : > { %v858_v37 = vsel %vm1935_vm13, %v854_v24, %v1907_v36 }
 0x265   : > { %993 = vst.msk [vmem:[%s1949_s13 + $0x68] sm:$0xff] %vm635_vm14, %v858_v37 }
 0x266   : > { %v842_v18 = vpop.permute.xlu0 %841  ;;  %v848_v23 = vpop.permute.xlu1 %847 }
 0x267   : > { %v853_v38 = vsel %vm518_vm12, %v830_v32, %v842_v18  ;;  %v856_v34 = vsel %vm518_vm12, %v836_v12, %v848_v23 }
 0x268   : > { %v857_v44 = vsel %vm1935_vm13, %v853_v38, %v1916_v40  ;;  %v860_v36 = vsel %vm1935_vm13, %v856_v34, %v1921_v41 }
 0x269   : > { %992 = vst.msk [vmem:[%s1949_s13 + $0x60] sm:$0xff] %vm635_vm14, %v857_v44  ;;  %995 = vst.msk [vmem:[%s1949_s13 + $0x78] sm:$0xff] %vm635_vm14, %v860_v36 }
 0x26a   : > { %v846_v46 = vpop.permute.xlu0 %845 }
 0x26b   : > { %v855_v40 = vsel %vm518_vm12, %v834_v33, %v846_v46 }
 0x26c   : > { %v859_v41 = vsel %vm1935_vm13, %v855_v40, %v1933_v48 }
 0x26d   : > { %994 = vst.msk [vmem:[%s1949_s13 + $0x70] sm:$0xff] %vm635_vm14, %v859_v41 }
 0x26e   : > { %1118 = shalt.err (!%p1115_p5)
}
 0x26f   : > { %s1119_s4 = scalar_lea.hbm %s2046_s23, 2048  ;;  %s1123_s29 = scalar_lea.hbm %s2104_s1, 4096 }
 0x270   : > { %p1120_p4 = scmp.ne.s32.totalorder %s2046_s23, %s1119_s4  ;;  %p1124_p12 = scmp.lt.u32.totalorder %s2046_s23, %s2104_s1 }
 0x271   : > { %p1125_p1 = scmp.lt.u32.totalorder %s1123_s29, %s1119_s4  ;;  %p1127_p8 = scmp.lt.u32.totalorder %s1119_s4, %s2046_s23 }
 0x272   : > { %p1121_p7 = pnand %p1120_p4, %p2128_p9 }
 0x273   : > { %p1126_p3 = por %p1125_p1, %p1124_p12 }
 0x274   : > { %p1122_p10 = pneg %p1121_p7 }
 0x275   : > { %p1128_p11 = por %p1127_p8, %p1126_p3 }
 0x277   : > { %p1129_p0 = pnand %p1128_p11, %p1122_p10 }
 0x279   : > { %1132 = shalt.err (!%p1129_p0)
}
 0x27a   : > { %s1199_s5 = smov 128   ;;  %s1200_s12 = smov 8  }
 0x27b   : > { %1005 = dma.vmem_to_hbm [thread:$0]  (%p2128_p9), %s2048_s16, 2048, %s2046_s23, %s872_s9, %s1199_s5, %s1199_s5, %s1200_s12  }
 0x27c PF: > { %s902_s13 = sand.u32 1, %s1167_s6   ;;  %p2129_p6 = scmp.ne.s32.totalorder %s2109_s21, 0 }
 0x27d   : > { %p2130_p13 = scmp.ge.s32.totalorder %s1187_s11, 2  ;;  %s903_s15 = scalar_lea.sflag [#allocation4], %s902_s13 }
 0x27f   : > { %p1012_p2 = pnand %p2130_p13, %p2129_p6 }
 0x281   : > { %1162 = dma.done.wait (!%p1012_p2), %s903_s15, 2048  }
 0x282   : > { %1164 = vsyncadd (!%p1012_p2), %s903_s15, 4294965248  ;;  %s17_s11 = sadd.s32 1, %s1187_s11   ;;  %s2131_s6 = smov %s1171_s7 }
 0x283   : > { %p14_p5 = scmp.ge.s32.totalorder %s17_s11, 4   ;;  %s2132_s7 = smov %s1175_s8 }
 0x284   : > { %s2133_s8 = smov %s1267_s20  ;;  %s2134_s9 = smov %s1183_s10 }
 0x285   : > { %s2135_s10 = smov %s2137_s14  ;;  %16 = sbr.rel (!%p14_p5) target bundleno = 6 (0x6), region = 72 }
 0x28c   :  { %908 = vsyncpa [#allocation3], 1 }
 0x28d   :  { %910 = vsyncpa [#allocation3 + $0x1], 1 }
 0x28e   :  { %911 = vsyncpa [#allocation4], 1 }
 0x28f   :  { %913 = vsyncpa [#allocation4 + $0x1], 1 }

</bundles_post_ra>
